<compile_context>
chip_gen: v7x
topology: tpu7x:2x2x1
jax: 0.10.0
libtpu: 0.0.40
codegen_flags: <defaults>
</compile_context>

<pallas_src>
import functools
import math

import numpy as np
import jax
import jax.numpy as jnp
from jax.experimental import pallas as pl
from jax.experimental.pallas import tpu as pltpu

_HI = jax.lax.Precision.HIGHEST


# ----------------------------- Pallas kernel ------------------------------ #

def ec_ca_sa2_kernel(x_ref, pool_ref, w10f_ref, bnshift_ref, w11_ref,
                     band_ref, rh_ref, rw_ref, sa_ref, o_ref, *, H, W, KK):
    HW = H * W
    x = x_ref[0]                                              # (C, H*W) f32

    # ---- directional + global pooling as ONE lane-dense MXU matmul -------
    # pool columns: [0:H] = mean over w (x_h), [H:H+W] = mean over h (x_w),
    #               [H+W]  = global average pool.
    pooled = jnp.dot(x, pool_ref[...], precision=_HI,
                     preferred_element_type=jnp.float32)      # (C, H+W+1)
    cat = pooled[:, :H + W]                                   # (C, H+W)
    avg = pooled[:, H + W:H + W + 1]                          # (C, 1)

    # ---- coordinate-attention branch (fused h|w strip) -------------------
    # conv10 (1x1, BN scale folded into weights) + BN shift + ReLU
    y = jnp.maximum(
        jnp.dot(w10f_ref[...], cat, precision=_HI,
                preferred_element_type=jnp.float32) + bnshift_ref[...],
        0.0)                                                  # (mch, H+W)
    # conv11 (1x1) back to C channels + sigmoid
    s = jax.nn.sigmoid(
        jnp.dot(w11_ref[...], y, precision=_HI,
                preferred_element_type=jnp.float32))          # (C, H+W)
    # outer product s_h x s_w directly in the flattened (C, H*W) layout via
    # exact 0/1 expansion matmuls (no reshapes / repeats needed).
    f_ca = (jnp.dot(s[:, :H], rh_ref[...], precision=_HI,
                    preferred_element_type=jnp.float32) *
            jnp.dot(s[:, H:H + W], rw_ref[...], precision=_HI,
                    preferred_element_type=jnp.float32))      # (C, H*W)

    # ---- ECA channel branch: Conv1d over channels as banded matmul -------
    f_ch = jnp.dot(band_ref[...], avg, precision=_HI,
                   preferred_element_type=jnp.float32)        # (C, 1)

    # ---- spatial branch: kxk conv on channel-mean map via shifted adds ---
    xc = jnp.mean(x, axis=0, keepdims=True)                   # (1, H*W)
    conv = jnp.zeros((1, HW), jnp.float32)
    p = KK // 2
    k = 0
    for dh in range(-p, p + 1):
        for dw in range(-p, p + 1):
            d = dh * W + dw
            shifted = pltpu.roll(xc, (-d) % HW, 1) if d else xc
            # sa_ref rows = conv21 tap * zero-padding boundary mask (host-folded)
            conv = conv + sa_ref[k:k + 1, :] * shifted
            k += 1
    f_sa = jax.nn.sigmoid(conv)                               # (1, H*W)

    # ---- combine gates and apply ------------------------------------------
    gate = f_ch + f_ca + f_sa                                 # (C, H*W)
    o_ref[0] = (x * gate).astype(o_ref.dtype)


# ------------------------------- wrapper ----------------------------------- #

def ec_ca_sa2_pallas(x, w10, w11, gamma, beta, run_mean, run_var, eps,
                     w20, w21):
    """Takes the raw module parameters; all folding done here (host-side)."""
    B, C, H, W = x.shape
    HW = H * W
    mch = w10.shape[0]
    ks = w20.shape[0]          # ECA 1D kernel size
    kk = w21.shape[0]          # spatial conv kernel size (3 or 7)
    pad1 = ks // 2
    p2 = kk // 2

    # BatchNorm (eval-mode) folded: scale into conv10 weights, shift separate.
    inv_std = gamma / jnp.sqrt(run_var + eps)
    w10f = (inv_std[:, None] * w10).astype(jnp.float32)            # (mch, C)
    bn_shift = (beta - run_mean * inv_std).reshape(mch, 1).astype(jnp.float32)

    # --- host-built structural matrices (static, numpy) ---------------------
    hh = np.arange(HW) // W
    ww = np.arange(HW) % W
    pool_np = np.zeros((HW, H + W + 1), np.float32)   # [x_h | x_w | avg]
    pool_np[np.arange(HW), hh] = 1.0 / W
    pool_np[np.arange(HW), H + ww] = 1.0 / H
    pool_np[:, H + W] = 1.0 / HW
    rh_np = (hh[None, :] == np.arange(H)[:, None]).astype(np.float32)  # (H,HW)
    rw_np = (ww[None, :] == np.arange(W)[:, None]).astype(np.float32)  # (W,HW)

    # ECA Conv1d(1,1,ks,padding=ks//2) over channels -> banded (C,C) matrix.
    sel = np.zeros((ks, C, C), np.float32)
    for j in range(ks):
        for i in range(C):
            src = i + j - pad1
            if 0 <= src < C:
                sel[j, i, src] = 1.0
    band = jnp.tensordot(w20.astype(jnp.float32), jnp.asarray(sel), axes=1)

    # conv21 taps pre-multiplied with zero-padding boundary masks, (kk*kk, HW),
    # rows ordered to match the kernel's (dh, dw) loop.
    masks = []
    for dh in range(-p2, p2 + 1):
        for dw in range(-p2, p2 + 1):
            ok = ((hh + dh >= 0) & (hh + dh < H) &
                  (ww + dw >= 0) & (ww + dw < W))
            masks.append(ok.astype(np.float32))
    masks_np = np.stack(masks, axis=0)
    sa_masked = (w21.reshape(kk * kk, 1).astype(jnp.float32)
                 * jnp.asarray(masks_np))                          # (kk*kk, HW)

    x_flat = x.reshape(B, C, HW)   # lane-dense; free for contiguous NCHW
    kernel = functools.partial(ec_ca_sa2_kernel, H=H, W=W, KK=kk)
    out_flat = pl.pallas_call(
        kernel,
        out_shape=jax.ShapeDtypeStruct((B, C, HW), x.dtype),
        grid=(B,),
        in_specs=[
            pl.BlockSpec((1, C, HW), lambda i: (i, 0, 0)),        # x
            pl.BlockSpec((HW, H + W + 1), lambda i: (0, 0)),      # pooling matrix
            pl.BlockSpec((mch, C), lambda i: (0, 0)),             # conv10 (BN folded)
            pl.BlockSpec((mch, 1), lambda i: (0, 0)),             # BN shift
            pl.BlockSpec((C, mch), lambda i: (0, 0)),             # conv11
            pl.BlockSpec((C, C), lambda i: (0, 0)),               # ECA band matrix
            pl.BlockSpec((H, HW), lambda i: (0, 0)),              # h expansion
            pl.BlockSpec((W, HW), lambda i: (0, 0)),              # w expansion
            pl.BlockSpec((kk * kk, HW), lambda i: (0, 0)),        # masked conv21 taps
        ],
        out_specs=pl.BlockSpec((1, C, HW), lambda i: (i, 0, 0)),
        compiler_params=pltpu.CompilerParams(
            dimension_semantics=("parallel",)),
    )(x_flat, jnp.asarray(pool_np), w10f, bn_shift,
      w11.astype(jnp.float32), band, jnp.asarray(rh_np), jnp.asarray(rw_np),
      sa_masked)
    return out_flat.reshape(B, C, H, W)


# -------------------------- pure-JAX reference ----------------------------- #

def ec_ca_sa2_ref(x, w10, w11, gamma, beta, run_mean, run_var, eps, w20, w21):
    B, C, H, W = x.shape
    # F_ch: global avg pool + 1D conv over channels (no sigmoid)
    avg = jnp.mean(x, axis=(2, 3))                               # (B, C)
    ks = w20.shape[0]
    pad = ks // 2
    avg_p = jnp.pad(avg, ((0, 0), (pad, pad)))
    f_ch = sum(w20[j] * avg_p[:, j:j + C] for j in range(ks))
    f_ch = f_ch[:, :, None, None]                                # (B,C,1,1)
    # F_sa: channel mean + kxk conv + sigmoid
    xc = jnp.mean(x, axis=1, keepdims=True)                      # (B,1,H,W)
    p2 = w21.shape[0] // 2
    conv = jax.lax.conv_general_dilated(
        xc, w21[None, None], window_strides=(1, 1),
        padding=((p2, p2), (p2, p2)),
        dimension_numbers=('NCHW', 'OIHW', 'NCHW'), precision=_HI)
    f_sa = jax.nn.sigmoid(conv)                                  # (B,1,H,W)
    # coordinate attention
    xh = jnp.mean(x, axis=3)                                     # (B,C,H)
    xw = jnp.mean(x, axis=2)                                     # (B,C,W)
    cat = jnp.concatenate([xh, xw], axis=2)                      # (B,C,H+W)
    z = jnp.einsum('oc,bcl->bol', w10, cat, precision=_HI)
    inv = gamma / jnp.sqrt(run_var + eps)
    z = jnp.maximum(z * inv[None, :, None]
                    + (beta - run_mean * inv)[None, :, None], 0.0)
    s = jax.nn.sigmoid(jnp.einsum('co,bol->bcl', w11, z, precision=_HI))
    s_h = s[:, :, :H]
    s_w = s[:, :, H:]
    f_ca = s_h[:, :, :, None] * s_w[:, :, None, :]               # (B,C,H,W)
    gate = f_ch + f_ca + f_sa
    return x * gate


# --------------------------------- main ------------------------------------ #

if __name__ == "__main__":
    B, C, H, W = 2, 32, 16, 16
    ratio, kernel_size = 16, 3
    mch = max(8, C // ratio)                     # 8

    # ECA-style 1D kernel size (same formula as the module).
    gamma_f, b_f = 2, 1
    ks = int(abs((math.log(C, 2) + b_f) / gamma_f))
    ks = ks if ks % 2 else ks + 1                # 3

    key = jax.random.PRNGKey(0)
    kx, k10, k11, k20, k21 = jax.random.split(key, 5)

    x = jax.random.normal(kx, (B, C, H, W), dtype=jnp.float32)
    w10 = jax.random.normal(k10, (mch, C), dtype=jnp.float32) * 0.1   # conv10
    w11 = jax.random.normal(k11, (C, mch), dtype=jnp.float32) * 0.1   # conv11
    w20 = jax.random.normal(k20, (ks,), dtype=jnp.float32) * 0.5      # conv20 taps
    w21 = jax.random.normal(k21, (kernel_size, kernel_size),
                            dtype=jnp.float32) * 0.2                  # conv21 3x3

    # BatchNorm2d(mch) eval-mode parameters.
    gamma = 1.0 + 0.1 * jnp.arange(mch, dtype=jnp.float32)
    beta = 0.05 * jnp.arange(mch, dtype=jnp.float32)
    run_mean = 0.01 * jnp.arange(mch, dtype=jnp.float32)
    run_var = 1.0 + 0.02 * jnp.arange(mch, dtype=jnp.float32)
    eps = 1e-5

    out = ec_ca_sa2_pallas(x, w10, w11, gamma, beta, run_mean, run_var, eps,
                           w20, w21)
    out = jax.block_until_ready(out)

    ref = ec_ca_sa2_ref(x, w10, w11, gamma, beta, run_mean, run_var, eps,
                        w20, w21)
    assert out.shape == (B, C, H, W)
    np.testing.assert_allclose(np.asarray(out), np.asarray(ref),
                               rtol=1e-4, atol=1e-4)

    print("KERNEL_OK")
</pallas_src>

<mosaic_0001>
module attributes {stable_mosaic.version = 11 : i64} {
  func.func @ec_ca_sa2_kernel(%arg0: i32, %arg1: memref<1x32x256xf32, #tpu.memory_space<vmem>>, %arg2: memref<256x33xf32, #tpu.memory_space<vmem>>, %arg3: memref<8x32xf32, #tpu.memory_space<vmem>>, %arg4: memref<8x1xf32, #tpu.memory_space<vmem>>, %arg5: memref<32x8xf32, #tpu.memory_space<vmem>>, %arg6: memref<32x32xf32, #tpu.memory_space<vmem>>, %arg7: memref<16x256xf32, #tpu.memory_space<vmem>>, %arg8: memref<16x256xf32, #tpu.memory_space<vmem>>, %arg9: memref<9x256xf32, #tpu.memory_space<vmem>>, %arg10: memref<1x32x256xf32, #tpu.memory_space<vmem>>) attributes {dimension_semantics = [#tpu.dimension_semantics<parallel>], iteration_bounds = array<i64: 2>, scalar_prefetch = 0 : i64, scratch_operands = 0 : i64, tpu.core_type = #tpu.core_type<tc>, window_params = [{transform_indices = @transform_0, window_bounds = array<i64: 1, 32, 256>}, {pipeline_mode = #tpu.pipeline_mode<synchronous>, transform_indices = @transform_1, window_bounds = array<i64: 256, 33>}, {pipeline_mode = #tpu.pipeline_mode<synchronous>, transform_indices = @transform_2, window_bounds = array<i64: 8, 32>}, {pipeline_mode = #tpu.pipeline_mode<synchronous>, transform_indices = @transform_3, window_bounds = array<i64: 8, 1>}, {pipeline_mode = #tpu.pipeline_mode<synchronous>, transform_indices = @transform_4, window_bounds = array<i64: 32, 8>}, {pipeline_mode = #tpu.pipeline_mode<synchronous>, transform_indices = @transform_5, window_bounds = array<i64: 32, 32>}, {pipeline_mode = #tpu.pipeline_mode<synchronous>, transform_indices = @transform_6, window_bounds = array<i64: 16, 256>}, {pipeline_mode = #tpu.pipeline_mode<synchronous>, transform_indices = @transform_7, window_bounds = array<i64: 16, 256>}, {pipeline_mode = #tpu.pipeline_mode<synchronous>, transform_indices = @transform_8, window_bounds = array<i64: 9, 256>}, {transform_indices = @transform_9, window_bounds = array<i64: 1, 32, 256>}]} {
    %c0 = arith.constant 0 : index
    %c0_0 = arith.constant 0 : index
    %c0_1 = arith.constant 0 : index
    %0 = vector.load %arg1[%c0, %c0_0, %c0_1] : memref<1x32x256xf32, #tpu.memory_space<vmem>>, vector<1x32x256xf32>
    %1 = vector.shape_cast %0 : vector<1x32x256xf32> to vector<32x256xf32>
    %c0_2 = arith.constant 0 : index
    %c0_3 = arith.constant 0 : index
    %2 = vector.load %arg2[%c0_2, %c0_3] : memref<256x33xf32, #tpu.memory_space<vmem>>, vector<256x33xf32>
    %cst = arith.constant dense<0.000000e+00> : vector<32x33xf32>
    %3 = tpu.matmul %1, %2, %cst {dimension_numbers = #tpu.dot_dimension_numbers<[1], [0], [0], [1], [0, 0, 1, 1], [], []>, precision = #tpu.contract_precision<fp32>} : vector<32x256xf32>, vector<256x33xf32>, vector<32x33xf32> -> vector<32x33xf32>
    %4 = vector.extract_strided_slice %3 {offsets = [0, 0], sizes = [32, 32], strides = [1, 1]} : vector<32x33xf32> to vector<32x32xf32>
    %5 = vector.extract_strided_slice %3 {offsets = [0, 32], sizes = [32, 1], strides = [1, 1]} : vector<32x33xf32> to vector<32x1xf32>
    %c0_4 = arith.constant 0 : index
    %c0_5 = arith.constant 0 : index
    %6 = vector.load %arg3[%c0_4, %c0_5] : memref<8x32xf32, #tpu.memory_space<vmem>>, vector<8x32xf32>
    %cst_6 = arith.constant dense<0.000000e+00> : vector<8x32xf32>
    %7 = tpu.matmul %6, %4, %cst_6 {dimension_numbers = #tpu.dot_dimension_numbers<[1], [0], [0], [1], [0, 0, 1, 1], [], []>, precision = #tpu.contract_precision<fp32>} : vector<8x32xf32>, vector<32x32xf32>, vector<8x32xf32> -> vector<8x32xf32>
    %c0_7 = arith.constant 0 : index
    %c0_8 = arith.constant 0 : index
    %8 = vector.load %arg4[%c0_7, %c0_8] : memref<8x1xf32, #tpu.memory_space<vmem>>, vector<8x1xf32>
    %9 = vector.broadcast %8 : vector<8x1xf32> to vector<8x32xf32>
    %10 = arith.addf %7, %9 : vector<8x32xf32>
    %cst_9 = arith.constant 0.000000e+00 : f32
    %11 = vector.broadcast %cst_9 : f32 to vector<8x32xf32>
    %12 = arith.maximumf %10, %11 : vector<8x32xf32>
    %c0_10 = arith.constant 0 : index
    %c0_11 = arith.constant 0 : index
    %13 = vector.load %arg5[%c0_10, %c0_11] : memref<32x8xf32, #tpu.memory_space<vmem>>, vector<32x8xf32>
    %cst_12 = arith.constant dense<0.000000e+00> : vector<32x32xf32>
    %14 = tpu.matmul %13, %12, %cst_12 {dimension_numbers = #tpu.dot_dimension_numbers<[1], [0], [0], [1], [0, 0, 1, 1], [], []>, precision = #tpu.contract_precision<fp32>} : vector<32x8xf32>, vector<8x32xf32>, vector<32x32xf32> -> vector<32x32xf32>
    %15 = arith.negf %14 : vector<32x32xf32>
    %16 = math.exp %15 : vector<32x32xf32>
    %cst_13 = arith.constant 1.000000e+00 : f32
    %17 = vector.broadcast %cst_13 : f32 to vector<32x32xf32>
    %18 = arith.addf %17, %16 : vector<32x32xf32>
    %19 = arith.divf %17, %18 : vector<32x32xf32>
    %20 = vector.extract_strided_slice %19 {offsets = [0, 0], sizes = [32, 16], strides = [1, 1]} : vector<32x32xf32> to vector<32x16xf32>
    %c0_14 = arith.constant 0 : index
    %c0_15 = arith.constant 0 : index
    %21 = vector.load %arg7[%c0_14, %c0_15] : memref<16x256xf32, #tpu.memory_space<vmem>>, vector<16x256xf32>
    %cst_16 = arith.constant dense<0.000000e+00> : vector<32x256xf32>
    %22 = tpu.matmul %20, %21, %cst_16 {dimension_numbers = #tpu.dot_dimension_numbers<[1], [0], [0], [1], [0, 0, 1, 1], [], []>, precision = #tpu.contract_precision<fp32>} : vector<32x16xf32>, vector<16x256xf32>, vector<32x256xf32> -> vector<32x256xf32>
    %23 = vector.extract_strided_slice %19 {offsets = [0, 16], sizes = [32, 16], strides = [1, 1]} : vector<32x32xf32> to vector<32x16xf32>
    %c0_17 = arith.constant 0 : index
    %c0_18 = arith.constant 0 : index
    %24 = vector.load %arg8[%c0_17, %c0_18] : memref<16x256xf32, #tpu.memory_space<vmem>>, vector<16x256xf32>
    %cst_19 = arith.constant dense<0.000000e+00> : vector<32x256xf32>
    %25 = tpu.matmul %23, %24, %cst_19 {dimension_numbers = #tpu.dot_dimension_numbers<[1], [0], [0], [1], [0, 0, 1, 1], [], []>, precision = #tpu.contract_precision<fp32>} : vector<32x16xf32>, vector<16x256xf32>, vector<32x256xf32> -> vector<32x256xf32>
    %26 = arith.mulf %22, %25 : vector<32x256xf32>
    %c0_20 = arith.constant 0 : index
    %c0_21 = arith.constant 0 : index
    %27 = vector.load %arg6[%c0_20, %c0_21] : memref<32x32xf32, #tpu.memory_space<vmem>>, vector<32x32xf32>
    %cst_22 = arith.constant dense<0.000000e+00> : vector<32x1xf32>
    %28 = tpu.matmul %27, %5, %cst_22 {dimension_numbers = #tpu.dot_dimension_numbers<[1], [0], [0], [1], [0, 0, 1, 1], [], []>, precision = #tpu.contract_precision<fp32>} : vector<32x32xf32>, vector<32x1xf32>, vector<32x1xf32> -> vector<32x1xf32>
    %cst_23 = arith.constant dense<0.000000e+00> : vector<256xf32>
    %29 = vector.multi_reduction <add>, %1, %cst_23 [0] : vector<32x256xf32> to vector<256xf32>
    %30 = vector.shape_cast %29 : vector<256xf32> to vector<1x256xf32>
    %cst_24 = arith.constant 3.200000e+01 : f32
    %31 = vector.broadcast %cst_24 : f32 to vector<1x256xf32>
    %32 = arith.divf %30, %31 : vector<1x256xf32>
    %cst_25 = arith.constant 0.000000e+00 : f32
    %33 = vector.broadcast %cst_25 : f32 to vector<1x256xf32>
    %c17_i32 = arith.constant 17 : i32
    %34 = tpu.dynamic_rotate %32 by %c17_i32 dim 1 : vector<1x256xf32>, i32 -> vector<1x256xf32>
    %c0_26 = arith.constant 0 : index
    %c0_27 = arith.constant 0 : index
    %35 = vector.load %arg9[%c0_26, %c0_27] : memref<9x256xf32, #tpu.memory_space<vmem>>, vector<1x256xf32>
    %36 = arith.mulf %35, %34 : vector<1x256xf32>
    %37 = arith.addf %33, %36 : vector<1x256xf32>
    %c16_i32 = arith.constant 16 : i32
    %38 = tpu.dynamic_rotate %32 by %c16_i32 dim 1 : vector<1x256xf32>, i32 -> vector<1x256xf32>
    %c1 = arith.constant 1 : index
    %c0_28 = arith.constant 0 : index
    %39 = vector.load %arg9[%c1, %c0_28] : memref<9x256xf32, #tpu.memory_space<vmem>>, vector<1x256xf32>
    %40 = arith.mulf %39, %38 : vector<1x256xf32>
    %41 = arith.addf %37, %40 : vector<1x256xf32>
    %c15_i32 = arith.constant 15 : i32
    %42 = tpu.dynamic_rotate %32 by %c15_i32 dim 1 : vector<1x256xf32>, i32 -> vector<1x256xf32>
    %c2 = arith.constant 2 : index
    %c0_29 = arith.constant 0 : index
    %43 = vector.load %arg9[%c2, %c0_29] : memref<9x256xf32, #tpu.memory_space<vmem>>, vector<1x256xf32>
    %44 = arith.mulf %43, %42 : vector<1x256xf32>
    %45 = arith.addf %41, %44 : vector<1x256xf32>
    %c1_i32 = arith.constant 1 : i32
    %46 = tpu.dynamic_rotate %32 by %c1_i32 dim 1 : vector<1x256xf32>, i32 -> vector<1x256xf32>
    %c3 = arith.constant 3 : index
    %c0_30 = arith.constant 0 : index
    %47 = vector.load %arg9[%c3, %c0_30] : memref<9x256xf32, #tpu.memory_space<vmem>>, vector<1x256xf32>
    %48 = arith.mulf %47, %46 : vector<1x256xf32>
    %49 = arith.addf %45, %48 : vector<1x256xf32>
    %c4 = arith.constant 4 : index
    %c0_31 = arith.constant 0 : index
    %50 = vector.load %arg9[%c4, %c0_31] : memref<9x256xf32, #tpu.memory_space<vmem>>, vector<1x256xf32>
    %51 = arith.mulf %50, %32 : vector<1x256xf32>
    %52 = arith.addf %49, %51 : vector<1x256xf32>
    %c255_i32 = arith.constant 255 : i32
    %53 = tpu.dynamic_rotate %32 by %c255_i32 dim 1 : vector<1x256xf32>, i32 -> vector<1x256xf32>
    %c5 = arith.constant 5 : index
    %c0_32 = arith.constant 0 : index
    %54 = vector.load %arg9[%c5, %c0_32] : memref<9x256xf32, #tpu.memory_space<vmem>>, vector<1x256xf32>
    %55 = arith.mulf %54, %53 : vector<1x256xf32>
    %56 = arith.addf %52, %55 : vector<1x256xf32>
    %c241_i32 = arith.constant 241 : i32
    %57 = tpu.dynamic_rotate %32 by %c241_i32 dim 1 : vector<1x256xf32>, i32 -> vector<1x256xf32>
    %c6 = arith.constant 6 : index
    %c0_33 = arith.constant 0 : index
    %58 = vector.load %arg9[%c6, %c0_33] : memref<9x256xf32, #tpu.memory_space<vmem>>, vector<1x256xf32>
    %59 = arith.mulf %58, %57 : vector<1x256xf32>
    %60 = arith.addf %56, %59 : vector<1x256xf32>
    %c240_i32 = arith.constant 240 : i32
    %61 = tpu.dynamic_rotate %32 by %c240_i32 dim 1 : vector<1x256xf32>, i32 -> vector<1x256xf32>
    %c7 = arith.constant 7 : index
    %c0_34 = arith.constant 0 : index
    %62 = vector.load %arg9[%c7, %c0_34] : memref<9x256xf32, #tpu.memory_space<vmem>>, vector<1x256xf32>
    %63 = arith.mulf %62, %61 : vector<1x256xf32>
    %64 = arith.addf %60, %63 : vector<1x256xf32>
    %c239_i32 = arith.constant 239 : i32
    %65 = tpu.dynamic_rotate %32 by %c239_i32 dim 1 : vector<1x256xf32>, i32 -> vector<1x256xf32>
    %c8 = arith.constant 8 : index
    %c0_35 = arith.constant 0 : index
    %66 = vector.load %arg9[%c8, %c0_35] : memref<9x256xf32, #tpu.memory_space<vmem>>, vector<1x256xf32>
    %67 = arith.mulf %66, %65 : vector<1x256xf32>
    %68 = arith.addf %64, %67 : vector<1x256xf32>
    %69 = arith.negf %68 : vector<1x256xf32>
    %70 = math.exp %69 : vector<1x256xf32>
    %cst_36 = arith.constant 1.000000e+00 : f32
    %71 = vector.broadcast %cst_36 : f32 to vector<1x256xf32>
    %72 = arith.addf %71, %70 : vector<1x256xf32>
    %73 = arith.divf %71, %72 : vector<1x256xf32>
    %74 = vector.broadcast %28 : vector<32x1xf32> to vector<32x256xf32>
    %75 = arith.addf %74, %26 : vector<32x256xf32>
    %76 = vector.broadcast %73 : vector<1x256xf32> to vector<32x256xf32>
    %77 = arith.addf %75, %76 : vector<32x256xf32>
    %78 = arith.mulf %1, %77 : vector<32x256xf32>
    %c0_37 = arith.constant 0 : index
    %c0_38 = arith.constant 0 : index
    %c0_39 = arith.constant 0 : index
    %79 = vector.load %arg10[%c0_37, %c0_38, %c0_39] : memref<1x32x256xf32, #tpu.memory_space<vmem>>, vector<1x32x256xf32>
    %80 = vector.shape_cast %79 : vector<1x32x256xf32> to vector<32x256xf32>
    %81 = vector.shape_cast %78 : vector<32x256xf32> to vector<1x32x256xf32>
    tpu.vector_store %arg10[%c0_37, %c0_38, %c0_39], %81 {strides = array<i32>} : memref<1x32x256xf32, #tpu.memory_space<vmem>>, vector<1x32x256xf32>,
    return
  }
  func.func @transform_0(%arg0: i32) -> (i32, i32, i32) {
    %c0_i32 = arith.constant 0 : i32
    %c0_i32_0 = arith.constant 0 : i32
    %c0_i32_1 = arith.constant 0 : i32
    return %arg0, %c0_i32, %c0_i32_0 : i32, i32, i32
  }
  func.func @transform_1(%arg0: i32) -> (i32, i32) {
    %c0_i32 = arith.constant 0 : i32
    %c0_i32_0 = arith.constant 0 : i32
    %c0_i32_1 = arith.constant 0 : i32
    return %c0_i32, %c0_i32_0 : i32, i32
  }
  func.func @transform_2(%arg0: i32) -> (i32, i32) {
    %c0_i32 = arith.constant 0 : i32
    %c0_i32_0 = arith.constant 0 : i32
    %c0_i32_1 = arith.constant 0 : i32
    return %c0_i32, %c0_i32_0 : i32, i32
  }
  func.func @transform_3(%arg0: i32) -> (i32, i32) {
    %c0_i32 = arith.constant 0 : i32
    %c0_i32_0 = arith.constant 0 : i32
    %c0_i32_1 = arith.constant 0 : i32
    return %c0_i32, %c0_i32_0 : i32, i32
  }
  func.func @transform_4(%arg0: i32) -> (i32, i32) {
    %c0_i32 = arith.constant 0 : i32
    %c0_i32_0 = arith.constant 0 : i32
    %c0_i32_1 = arith.constant 0 : i32
    return %c0_i32, %c0_i32_0 : i32, i32
  }
  func.func @transform_5(%arg0: i32) -> (i32, i32) {
    %c0_i32 = arith.constant 0 : i32
    %c0_i32_0 = arith.constant 0 : i32
    %c0_i32_1 = arith.constant 0 : i32
    return %c0_i32, %c0_i32_0 : i32, i32
  }
  func.func @transform_6(%arg0: i32) -> (i32, i32) {
    %c0_i32 = arith.constant 0 : i32
    %c0_i32_0 = arith.constant 0 : i32
    %c0_i32_1 = arith.constant 0 : i32
    return %c0_i32, %c0_i32_0 : i32, i32
  }
  func.func @transform_7(%arg0: i32) -> (i32, i32) {
    %c0_i32 = arith.constant 0 : i32
    %c0_i32_0 = arith.constant 0 : i32
    %c0_i32_1 = arith.constant 0 : i32
    return %c0_i32, %c0_i32_0 : i32, i32
  }
  func.func @transform_8(%arg0: i32) -> (i32, i32) {
    %c0_i32 = arith.constant 0 : i32
    %c0_i32_0 = arith.constant 0 : i32
    %c0_i32_1 = arith.constant 0 : i32
    return %c0_i32, %c0_i32_0 : i32, i32
  }
  func.func @transform_9(%arg0: i32) -> (i32, i32, i32) {
    %c0_i32 = arith.constant 0 : i32
    %c0_i32_0 = arith.constant 0 : i32
    %c0_i32_1 = arith.constant 0 : i32
    return %arg0, %c0_i32, %c0_i32_0 : i32, i32, i32
  }
}

</mosaic_0001>

<bundles_post_ra>
// kernel: tpu_custom_call.1
= control target key start
LH: loop header
LB: loop body
LE: loop exit
PB: predicated region body
PF: predicated region fallthrough
CT: control target
= control target key end

     0   :  { %14 = vsyncpa [#allocation3], 0  ;;  %s7461_s0 = inlined_call_operand.vmem [shape: f32[2,32,256], index: 0, kind: input, shape index: {}]   ;;  %s7462_s1 = inlined_call_operand.vmem [shape: f32[256,33], index: 1, kind: input, shape index: {}]   ;;  %s7463_s2 = inlined_call_operand.vmem [shape: f32[8,32], index: 2, kind: input, shape index: {}]   ;;  %s7464_s3 = inlined_call_operand.vmem [shape: f32[8,1], index: 3, kind: input, shape index: {}]   ;;  %s7465_s4 = inlined_call_operand.vmem [shape: f32[32,8], index: 4, kind: input, shape index: {}]   ;;  %s7466_s5 = inlined_call_operand.vmem [shape: f32[32,32], index: 5, kind: input, shape index: {}]   ;;  %s7467_s6 = inlined_call_operand.vmem [shape: f32[16,256], index: 6, kind: input, shape index: {}]   ;;  %s7468_s7 = inlined_call_operand.vmem [shape: f32[16,256], index: 7, kind: input, shape index: {}]   ;;  %s7469_s8 = inlined_call_operand.vmem [shape: f32[9,256], index: 8, kind: input, shape index: {}]   ;;  %s7470_s9 = inlined_call_operand.hbm [shape: f32[2,32,256], index: 9, kind: output, shape index: {}]  }
   0x1   :  { %16 = vsyncpa [#allocation3 + $0x1], 0  ;;  %s6167_s30 = smov 0   ;;  %s6169_s10 = smov 0  }
   0x2   :  { %s6171_s11 = smov 0   ;;  %s6173_s12 = smov 0  }
   0x3 LB: > { %s6188_s13 = sadd.s32 4294967295, %s6099_s12   ;;  %s4902_s14 = sadd.s32 4294967294, %s6099_s12   ;;  %s6099_s12 = sphi %s6173_s12, %s7618_s12   ;;  %s6095_s11 = sphi %s6171_s11, %s7617_s11   ;;  %s6091_s10 = sphi %s6169_s10, %s7616_s10   ;;  %s6087_s30 = sphi %s6167_s30, %s7615_s30  }
   0x4   : > { %s6192_s15 = sadd.s32 1, %s6099_s12   ;;  %s223_s16 = sadd.s32 1, %s6095_s11 }
   0x5   : > { %s220_s17 = ssub.s32 %s6099_s12, %s6192_s15  ;;  %p233_p0 = scmp.ne.s32.totalorder %s6095_s11, %s6091_s10 }
   0x6   : > { %p221_p1 = scmp.eq.s32.totalorder %s220_s17, 0  ;;  %p234_p2 = scmp.eq.s32.totalorder %s6188_s13, 1 }
   0x7   : > { %p239_p3 = scmp.ne.s32.totalorder %s6091_s10, %s6087_s30  ;;  %p240_p4 = scmp.eq.s32.totalorder %s4902_s14, 1 }
   0x8   : > { %s6203_s18 = scalar_select %p221_p1, %s6095_s11, %s223_s16  }
   0x9   : > { %p6205_p5 = por %p234_p2, %p233_p0  ;;  %p6209_p6 = por %p240_p4, %p239_p3 }
   0xa   : > { %p4905_p7 = scmp.ge.s32.totalorder %s6099_s12, 1  ;;  %p290_p8 = scmp.lt.s32.totalorder %s6099_s12, 3 }
   0xc   : > { %p291_p9 = pnand %p4905_p7, %p290_p8 }
   0xe   : > { %294 = sbr.rel (%p291_p9) target bundleno = 1409 (0x581), region = 56 }
  0x15   : > { %v355_v0 = vld [vmem:[%s7462_s1 + $0x80] sm:$0xff]  ;;  %v356_v1 = vld [vmem:[%s7462_s1 + $0x88] sm:$0xff]  ;;  %v357_v7 = vld [vmem:[%s7462_s1 + $0x90] sm:$0xff]  ;;  %p326_p10 = scmp.lt.s32.totalorder %s6188_s13, 1  ;;  %vm6103_vm0 = vmmov 0   ;;  %vm1408_vm1 = vcmask 261120  }
  0x16   : > { %v339_v2 = vld [vmem:[%s7462_s1] sm:$0xff]  ;;  %v420_v3 = vand.u32 4294901760, %v355_v0  ;;  %v423_v4 = vand.u32 4294901760, %v356_v1  ;;  %v340_v5 = vld [vmem:[%s7462_s1 + $0x8] sm:$0xff]  ;;  %v358_v8 = vld [vmem:[%s7462_s1 + $0x98] sm:$0xff]  ;;  %v426_v10 = vand.u32 4294901760, %v357_v7 }
  0x17   : > { %v372_v6 = vand.u32 4294901760, %v339_v2  ;;  %v375_v9 = vand.u32 4294901760, %v340_v5  ;;  %v429_v11 = vand.u32 4294901760, %v358_v8  ;;  %v341_v12 = vld [vmem:[%s7462_s1 + $0x10] sm:$0xff]  ;;  %v342_v13 = vld [vmem:[%s7462_s1 + $0x18] sm:$0xff]  ;;  %v359_v18 = vld [vmem:[%s7462_s1 + $0xa0] sm:$0xff] }
  0x18   : > { %v6239_v14 = vpack.c.bf16 %v423_v4, %v420_v3  ;;  %v378_v16 = vand.u32 4294901760, %v341_v12  ;;  %v381_v17 = vand.u32 4294901760, %v342_v13  ;;  %v360_v19 = vld [vmem:[%s7462_s1 + $0xa8] sm:$0xff]  ;;  %v343_v23 = vld [vmem:[%s7462_s1 + $0x20] sm:$0xff]  ;;  %v6262_v25 = vsub.f32 %v357_v7, %v426_v10  ;;  %v361_v36 = vld [vmem:[%s7462_s1 + $0xb0] sm:$0xff]  ;;  %s6437_s27 = scalar_select %p326_p10, %s6188_s13, 1 }
  0x19   : > { %v6241_v15 = vsub.f32 %v339_v2, %v372_v6  ;;  %v6249_v20 = vpack.c.bf16 %v375_v9, %v372_v6  ;;  %v6251_v21 = vsub.f32 %v340_v5, %v375_v9  ;;  %v6253_v22 = vpack.c.bf16 %v429_v11, %v426_v10  ;;  %v344_v24 = vld [vmem:[%s7462_s1 + $0x28] sm:$0xff]  ;;  %v362_v41 = vld [vmem:[%s7462_s1 + $0xb8] sm:$0xff]  ;;  %v345_v54 = vld [vmem:[%s7462_s1 + $0x30] sm:$0xff]  ;;  %s6106_s25 = smov 112   ;;  %s6108_s23 = smov 16  }
  0x1a   : > { %7543 = vst [vmem:[#allocation5_spill] sm:$0xff] %v6239_v14  ;;  %5500 = vmatprep.subr.bf16.mxu0 %v6239_v14  ;;  %v6264_v26 = vsub.f32 %v358_v8, %v429_v11  ;;  %v6266_v27 = vpack.c.bf16 %v381_v17, %v378_v16  ;;  %v432_v28 = vand.u32 4294901760, %v359_v18  ;;  %v435_v29 = vand.u32 4294901760, %v360_v19  ;;  %v346_v55 = vld [vmem:[%s7462_s1 + $0x38] sm:$0xff]  ;;  %v364_v5 = vld [vmem:[%s7462_s1 + $0xc8] sm:$0xff]  ;;  %v347_v10 = vld [vmem:[%s7462_s1 + $0x40] sm:$0xff] }
  0x1b   : > { %5502 = vmatpush3.bf16.msra.mxu0 %v6249_v20  ;;  %v6269_v30 = vsub.f32 %v355_v0, %v420_v3  ;;  %v6271_v31 = vsub.f32 %v356_v1, %v423_v4  ;;  %v384_v32 = vand.u32 4294901760, %v343_v23  ;;  %v387_v33 = vand.u32 4294901760, %v344_v24  ;;  %v363_v4 = vld [vmem:[%s7462_s1 + $0xc0] sm:$0xff]  ;;  %s4927_s22 = sshll.u32 %s6437_s27, 6  ;;  %s6109_s24 = smov 15  }
  0x1c   : > { %7544 = vst [vmem:[#allocation6_spill] sm:$0xff] %v6266_v27  ;;  %5504 = vmatprep.subr.bf16.mxu0 %v6253_v22  ;;  %v7488_v34 = vand.u32 4294901760, %v6241_v15  ;;  %v7487_v35 = vand.u32 4294901760, %v6251_v21  ;;  %v6279_v37 = vsub.f32 %v341_v12, %v378_v16  ;;  %v6281_v38 = vsub.f32 %v342_v13, %v381_v17  ;;  %s6494_s29 = scalar_lea.vmem %s7461_s0, %s4927_s22  ;;  %s6105_s22 = smov 96  }
  0x1d   : > { %v6283_v39 = vpack.c.bf16 %v435_v29, %v432_v28  ;;  %v7490_v40 = vand.u32 4294901760, %v6269_v30  ;;  %v6289_v42 = vsub.f32 %v359_v18, %v432_v28  ;;  %v6291_v43 = vsub.f32 %v360_v19, %v435_v29  ;;  %s6110_s26 = smov 1   ;;  %s6111_s27 = smov 127  }
  0x1e   : > { %v7489_v44 = vand.u32 4294901760, %v6271_v31  ;;  %v6294_v45 = vpack.c.bf16 %v387_v33, %v384_v32  ;;  %v532_v47 = vsub.f32 %v6241_v15, %v7488_v34  ;;  %v539_v48 = vsub.f32 %v6251_v21, %v7487_v35  ;;  %s6112_s28 = smov 113   ;;  %s6113_s14 = smov 111  }
  0x1f   : > { %5506 = vmatpush3.bf16.msra.mxu0 %v6266_v27  ;;  %v644_v46 = vsub.f32 %v6269_v30, %v7490_v40  ;;  %v438_v49 = vand.u32 4294901760, %v361_v36  ;;  %v441_v51 = vand.u32 4294901760, %v362_v41  ;;  %v7484_v52 = vand.u32 4294901760, %v6262_v25 }
  0x20   : > { %5508 = vmatprep.subr.bf16.mxu0 %v6283_v39  ;;  %v651_v50 = vsub.f32 %v6271_v31, %v7489_v44  ;;  %v7483_v53 = vand.u32 4294901760, %v6264_v26  ;;  %v6318_v57 = vsub.f32 %v343_v23, %v384_v32  ;;  %v533_v58 = vand.u32 4294901760, %v532_v47 }
  0x21   : > { %v645_v56 = vand.u32 4294901760, %v644_v46  ;;  %v540_v59 = vand.u32 4294901760, %v539_v48  ;;  %v6320_v61 = vsub.f32 %v344_v24, %v387_v33  ;;  %v6322_v62 = vpack.c.bf16 %v441_v51, %v438_v49  ;;  %v348_v24 = vld [vmem:[%s7462_s1 + $0x48] sm:$0xff] }
  0x22   : > { %v652_v60 = vand.u32 4294901760, %v651_v50  ;;  %v658_v63 = vsub.f32 %v6262_v25, %v7484_v52  ;;  %v665_v1 = vsub.f32 %v6264_v26, %v7483_v53  ;;  %v390_v2 = vand.u32 4294901760, %v345_v54 }
  0x23   : > { %5510 = vmatpush3.bf16.msra.mxu0 %v6294_v45  ;;  %v5533_v0 = vpack.c.bf16 %v540_v59, %v533_v58  ;;  %v393_v3 = vand.u32 4294901760, %v346_v55  ;;  %v7480_v8 = vand.u32 4294901760, %v6279_v37  ;;  %v7479_v9 = vand.u32 4294901760, %v6281_v38 }
  0x24   : > { %v5531_v6 = vpack.c.bf16 %v652_v60, %v645_v56  ;;  %5512 = vmatprep.subr.bf16.mxu0 %v6322_v62  ;;  %v659_v7 = vand.u32 4294901760, %v658_v63  ;;  %v6343_v11 = vsub.f32 %v361_v36, %v438_v49  ;;  %v6345_v12 = vsub.f32 %v362_v41, %v441_v51  ;;  %v366_v56 = vld [vmem:[%s7462_s1 + $0xd8] sm:$0xff]  ;;  %v349_v63 = vld [vmem:[%s7462_s1 + $0x50] sm:$0xff] }
  0x25   : > { %v666_v13 = vand.u32 4294901760, %v665_v1  ;;  %v6347_v16 = vpack.c.bf16 %v393_v3, %v390_v2  ;;  %v546_v17 = vsub.f32 %v6279_v37, %v7480_v8  ;;  %v553_v18 = vsub.f32 %v6281_v38, %v7479_v9 }
  0x26   : > { %5532 = vmatprep.subr.bf16.mxu1 %v5531_v6  ;;  %v444_v19 = vand.u32 4294901760, %v363_v4  ;;  %v447_v23 = vand.u32 4294901760, %v364_v5  ;;  %v7477_v29 = vand.u32 4294901760, %v6289_v42  ;;  %v7476_v32 = vand.u32 4294901760, %v6291_v43 }
  0x27   : > { %5534 = vmatpush3.bf16.msra.mxu1 %v5533_v0  ;;  %v5535_v28 = vpack.c.bf16 %v666_v13, %v659_v7  ;;  %5514 = vmatpush3.bf16.msra.mxu0 %v6347_v16  ;;  %v396_v33 = vand.u32 4294901760, %v347_v10  ;;  %v6361_v36 = vsub.f32 %v345_v54, %v390_v2  ;;  %v547_v41 = vand.u32 4294901760, %v546_v17  ;;  %v365_v54 = vld [vmem:[%s7462_s1 + $0xd0] sm:$0xff] }
  0x28   : > { %v554_v46 = vand.u32 4294901760, %v553_v18  ;;  %v6363_v47 = vpack.c.bf16 %v447_v23, %v444_v19  ;;  %v6365_v48 = vsub.f32 %v346_v55, %v393_v3  ;;  %v672_v49 = vsub.f32 %v6289_v42, %v7477_v29 }
  0x29   : > { %5536 = vmatprep.subr.bf16.mxu1 %v5535_v28  ;;  %v679_v50 = vsub.f32 %v6291_v43, %v7476_v32  ;;  %v399_v51 = vand.u32 4294901760, %v348_v24  ;;  %v6380_v55 = vsub.f32 %v363_v4, %v444_v19  ;;  %v7474_v59 = vand.u32 4294901760, %v6318_v57 }
  0x2a   : > { %v5537_v58 = vpack.c.bf16 %v554_v46, %v547_v41  ;;  %5516 = vmatprep.subr.bf16.mxu0 %v6363_v47  ;;  %v7473_v60 = vand.u32 4294901760, %v6320_v61  ;;  %v6387_v0 = vsub.f32 %v364_v5, %v447_v23  ;;  %v673_v1 = vand.u32 4294901760, %v672_v49  ;;  %v350_v5 = vld [vmem:[%s7462_s1 + $0x58] sm:$0xff] }
  0x2b   : > { %v680_v2 = vand.u32 4294901760, %v679_v50  ;;  %v6389_v3 = vpack.c.bf16 %v399_v51, %v396_v33  ;;  %v560_v4 = vsub.f32 %v6318_v57, %v7474_v59  ;;  %v450_v7 = vand.u32 4294901760, %v365_v54 }
  0x2c   : > { %5538 = vmatpush3.bf16.msra.mxu1 %v5537_v58  ;;  %v567_v6 = vsub.f32 %v6320_v61, %v7473_v60  ;;  %v453_v13 = vand.u32 4294901760, %v366_v56  ;;  %v7472_v18 = vand.u32 4294901760, %v6343_v11  ;;  %v7471_v19 = vand.u32 4294901760, %v6345_v12 }
  0x2d   : > { %v5539_v17 = vpack.c.bf16 %v680_v2, %v673_v1  ;;  %5518 = vmatpush3.bf16.msra.mxu0 %v6389_v3  ;;  %v402_v23 = vand.u32 4294901760, %v349_v63  ;;  %v6404_v28 = vsub.f32 %v347_v10, %v396_v33  ;;  %v561_v41 = vand.u32 4294901760, %v560_v4  ;;  %v367_v10 = vld [vmem:[%s7462_s1 + $0xe0] sm:$0xff] }
  0x2e   : > { %v568_v46 = vand.u32 4294901760, %v567_v6  ;;  %v6406_v49 = vpack.c.bf16 %v453_v13, %v450_v7  ;;  %v6408_v50 = vsub.f32 %v348_v24, %v399_v51  ;;  %v686_v58 = vsub.f32 %v6343_v11, %v7472_v18  ;;  %v368_v24 = vld [vmem:[%s7462_s1 + $0xe8] sm:$0xff] }
  0x2f   : > { %5540 = vmatprep.subr.bf16.mxu1 %v5539_v17  ;;  %v693_v1 = vsub.f32 %v6345_v12, %v7471_v19  ;;  %v405_v2 = vand.u32 4294901760, %v350_v5  ;;  %v6423_v51 = vsub.f32 %v365_v54, %v450_v7  ;;  %v7475_v4 = vand.u32 4294901760, %v6361_v36  ;;  %v351_v17 = vld [vmem:[%s7462_s1 + $0x60] sm:$0xff] }
  0x30   : > { %7545 = vst [vmem:[#allocation7_spill] sm:$0xff] %v6406_v49  ;;  %v5541_v33 = vpack.c.bf16 %v568_v46, %v561_v41  ;;  %5520 = vmatprep.subr.bf16.mxu0 %v6406_v49  ;;  %v7478_v6 = vand.u32 4294901760, %v6365_v48  ;;  %v6430_v19 = vsub.f32 %v366_v56, %v453_v13  ;;  %v687_v18 = vand.u32 4294901760, %v686_v58  ;;  %v352_v56 = vld [vmem:[%s7462_s1 + $0x68] sm:$0xff] }
  0x31   : > { %v694_v60 = vand.u32 4294901760, %v693_v1  ;;  %v6432_v59 = vpack.c.bf16 %v405_v2, %v402_v23  ;;  %v574_v54 = vsub.f32 %v6361_v36, %v7475_v4  ;;  %v456_v41 = vand.u32 4294901760, %v367_v10 }
  0x32   : > { %5542 = vmatpush3.bf16.msra.mxu1 %v5541_v33  ;;  %v581_v7 = vsub.f32 %v6365_v48, %v7478_v6  ;;  %v459_v46 = vand.u32 4294901760, %v368_v24  ;;  %v7482_v58 = vand.u32 4294901760, %v6380_v55  ;;  %v7481_v1 = vand.u32 4294901760, %v6387_v0 }
  0x33   : > { %7546 = vst [vmem:[#allocation8_spill] sm:$0xff] %v6432_v59  ;;  %v5543_v13 = vpack.c.bf16 %v694_v60, %v687_v18  ;;  %5522 = vmatpush3.bf16.msra.mxu0 %v6432_v59  ;;  %v408_v33 = vand.u32 4294901760, %v351_v17  ;;  %v6451_v4 = vsub.f32 %v349_v63, %v402_v23  ;;  %v575_v32 = vand.u32 4294901760, %v574_v54  ;;  %v369_v63 = vld [vmem:[%s7462_s1 + $0xf0] sm:$0xff]  ;;  %v370_v23 = vld [vmem:[%s7462_s1 + $0xf8] sm:$0xff] }
  0x34   : > { %v582_v29 = vand.u32 4294901760, %v581_v7  ;;  %v6453_v6 = vpack.c.bf16 %v459_v46, %v456_v41  ;;  %v6455_v9 = vsub.f32 %v350_v5, %v405_v2  ;;  %v700_v60 = vsub.f32 %v6380_v55, %v7482_v58 }
  0x35   : > { %5544 = vmatprep.subr.bf16.mxu1 %v5543_v13  ;;  %v707_v18 = vsub.f32 %v6387_v0, %v7481_v1  ;;  %v411_v8 = vand.u32 4294901760, %v352_v56  ;;  %v6471_v2 = vsub.f32 %v367_v10, %v456_v41  ;;  %v7486_v54 = vand.u32 4294901760, %v6404_v28  ;;  %v353_v13 = vld [vmem:[%s7462_s1 + $0x70] sm:$0xff] }
  0x36   : > { %7547 = vst [vmem:[#allocation9_spill] sm:$0xff] %v6453_v6  ;;  %v5545_v5 = vpack.c.bf16 %v582_v29, %v575_v32  ;;  %5524 = vmatprep.subr.bf16.mxu0 %v6453_v6  ;;  %v7485_v7 = vand.u32 4294901760, %v6408_v50  ;;  %v6478_v1 = vsub.f32 %v368_v24, %v459_v46  ;;  %v701_v58 = vand.u32 4294901760, %v700_v60  ;;  %v354_v24 = vld [vmem:[%s7462_s1 + $0x78] sm:$0xff]  ;;  %v331_v6 = vld [vmem:[%s6494_s29] sm:$0xff] }
  0x37   : > { %v708_v53 = vand.u32 4294901760, %v707_v18  ;;  %v6480_v52 = vpack.c.bf16 %v411_v8, %v408_v33  ;;  %v588_v29 = vsub.f32 %v6404_v28, %v7486_v54  ;;  %v462_v10 = vand.u32 4294901760, %v369_v63 }
  0x38   : > { %5546 = vmatpush3.bf16.msra.mxu1 %v5545_v5  ;;  %v595_v32 = vsub.f32 %v6408_v50, %v7485_v7  ;;  %v465_v41 = vand.u32 4294901760, %v370_v23  ;;  %v7493_v60 = vand.u32 4294901760, %v6423_v51  ;;  %v7496_v18 = vand.u32 4294901760, %v6430_v19 }
  0x39   : > { %7548 = vst [vmem:[#allocation10_spill] sm:$0xff] %v6480_v52  ;;  %v5547_v46 = vpack.c.bf16 %v708_v53, %v701_v58  ;;  %5526 = vmatpush3.bf16.msra.mxu0 %v6480_v52  ;;  %v414_v5 = vand.u32 4294901760, %v353_v13  ;;  %v6499_v7 = vsub.f32 %v351_v17, %v408_v33  ;;  %v589_v54 = vand.u32 4294901760, %v588_v29  ;;  %v332_v52 = vld [vmem:[%s6494_s29 + $0x8] sm:$0xff] }
  0x3a   : > { %v596_v35 = vand.u32 4294901760, %v595_v32  ;;  %v6501_v34 = vpack.c.bf16 %v465_v41, %v462_v10  ;;  %v6503_v44 = vsub.f32 %v352_v56, %v411_v8  ;;  %v714_v53 = vsub.f32 %v6423_v51, %v7493_v60 }
  0x3b   : > { %5548 = vmatprep.subr.bf16.mxu1 %v5547_v46  ;;  %v721_v58 = vsub.f32 %v6430_v19, %v7496_v18  ;;  %v417_v40 = vand.u32 4294901760, %v354_v24  ;;  %v6513_v33 = vsub.f32 %v369_v63, %v462_v10  ;;  %v7498_v29 = vand.u32 4294901760, %v6451_v4 }
  0x3c   : > { %7549 = vst [vmem:[#allocation11_spill] sm:$0xff] %v6501_v34  ;;  %v5549_v17 = vpack.c.bf16 %v596_v35, %v589_v54  ;;  %5528 = vmatprep.subr.bf16.mxu0 %v6501_v34  ;;  %v7497_v8 = vand.u32 4294901760, %v6455_v9  ;;  %v6517_v56 = vsub.f32 %v370_v23, %v465_v41  ;;  %v715_v32 = vand.u32 4294901760, %v714_v53 }
  0x3d   : > { %v722_v46 = vand.u32 4294901760, %v721_v58  ;;  %v6519_v60 = vpack.c.bf16 %v417_v40, %v414_v5  ;;  %v6522_v18 = vsub.f32 %v353_v13, %v414_v5  ;;  %v602_v35 = vsub.f32 %v6451_v4, %v7498_v29 }
  0x3e   : > { %5550 = vmatpush3.bf16.msra.mxu1 %v5549_v17  ;;  %v609_v63 = vsub.f32 %v6455_v9, %v7497_v8  ;;  %v6530_v54 = vand.u32 4294901760, %v332_v52  ;;  %v7503_v10 = vand.u32 4294901760, %v6471_v2  ;;  %v7506_v41 = vand.u32 4294901760, %v6478_v1 }
  0x3f   : > { %7550 = vst [vmem:[#allocation12_spill] sm:$0xff] %v6519_v60  ;;  %7551 = vst [vmem:[#allocation13_spill] sm:$0xff] %v6522_v18  ;;  %v5551_v23 = vpack.c.bf16 %v722_v46, %v715_v32  ;;  %5530 = vmatpush3.bf16.msra.mxu0 %v6519_v60  ;;  %v5563_v13 = vpack.c.bf16 %v6271_v31, %v6269_v30  ;;  %v603_v5 = vand.u32 4294901760, %v602_v35  ;;  %v6540_v17 = vand.u32 4294901760, %v331_v6 }
  0x40   : > { %7552 = vst [vmem:[#allocation14_spill] sm:$0xff] %v6530_v54  ;;  %v610_v53 = vand.u32 4294901760, %v609_v63  ;;  %v6538_v58 = vsub.f32 %v332_v52, %v6530_v54  ;;  %753 = vmatprep.mubr.f32.mxu1 %v6530_v54  ;;  %v728_v32 = vsub.f32 %v6471_v2, %v7503_v10  ;;  %v735_v46 = vsub.f32 %v6478_v1, %v7506_v41 }
  0x41   : > { %7553 = vst [vmem:[#allocation15_spill] sm:$0xff] %v6540_v17  ;;  %5552 = vmatprep.subr.bf16.mxu1 %v5551_v23  ;;  %5564 = vmatprep.subr.bf16.mxu0 %v5563_v13  ;;  %v7504_v35 = vand.u32 4294901760, %v6499_v7  ;;  %v7505_v63 = vand.u32 4294901760, %v6503_v44  ;;  %v6551_v52 = vsub.f32 %v354_v24, %v417_v40  ;;  %v6555_v23 = vsub.f32 %v331_v6, %v6540_v17 }
  0x42   : > { %v5553_v8 = vpack.c.bf16 %v610_v53, %v603_v5  ;;  %v7507_v29 = vand.u32 4294901760, %v6538_v58  ;;  %v729_v54 = vand.u32 4294901760, %v728_v32  ;;  %v736_v60 = vand.u32 4294901760, %v735_v46 }
  0x43   : > { %7554 = vst [vmem:[#allocation16_spill] sm:$0xff] %v6551_v52  ;;  %7555 = vst [vmem:[#allocation17_spill] sm:$0xff] %v6555_v23  ;;  %v616_v10 = vsub.f32 %v6499_v7, %v7504_v35  ;;  %v623_v13 = vsub.f32 %v6503_v44, %v7505_v63  ;;  %v7508_v24 = vand.u32 4294901760, %v6555_v23  ;;  %v7509_v6 = vand.u32 4294901760, %v6513_v33 }
  0x44   : > { %5554 = vmatpush3.bf16.msra.mxu1 %v5553_v8  ;;  %v470_v40 = vsub.f32 %v6538_v58, %v7507_v29  ;;  %v7512_v5 = vand.u32 4294901760, %v6517_v56  ;;  %v5555_v53 = vpack.c.bf16 %v736_v60, %v729_v54  ;;  %v5565_v60 = vpack.c.bf16 %v6251_v21, %v6241_v15 }
  0x45   : > { %v617_v32 = vand.u32 4294901760, %v616_v10  ;;  %v624_v46 = vand.u32 4294901760, %v623_v13  ;;  %v476_v8 = vsub.f32 %v6555_v23, %v7508_v24  ;;  %v742_v63 = vsub.f32 %v6513_v33, %v7509_v6  ;;  %v334_v13 = vld [vmem:[%s6494_s29 + $0x18] sm:$0xff] }
  0x46   : > { %v471_v35 = vand.u32 4294901760, %v470_v40  ;;  %v749_v41 = vsub.f32 %v6517_v56, %v7512_v5  ;;  %5556 = vmatprep.subr.bf16.mxu1 %v5555_v53  ;;  %v7515_v54 = vand.u32 4294901760, %v6522_v18  ;;  %v7516_v10 = vand.u32 4294901760, %v6551_v52  ;;  %v333_v5 = vld [vmem:[%s6494_s29 + $0x10] sm:$0xff] }
  0x47   : > { %v5557_v29 = vpack.c.bf16 %v624_v46, %v617_v32  ;;  %v477_v40 = vand.u32 4294901760, %v476_v8  ;;  %v743_v24 = vand.u32 4294901760, %v742_v63  ;;  %v5567_v34 = vpack.c.bf16 %v6264_v26, %v6262_v25  ;;  %v336_v46 = vld [vmem:[%s6494_s29 + $0x28] sm:$0xff] }
  0x48   : > { %472 = vmatprep.mubr.f32.mxu0 %v471_v35  ;;  %v750_v6 = vand.u32 4294901760, %v749_v41  ;;  %v630_v53 = vsub.f32 %v6522_v18, %v7515_v54  ;;  %v637_v32 = vsub.f32 %v6551_v52, %v7516_v10  ;;  %v5569_v41 = vpack.c.bf16 %v6281_v38, %v6279_v37  ;;  %v335_v54 = vld [vmem:[%s6494_s29 + $0x20] sm:$0xff] }
  0x49   : > { %5558 = vmatpush3.bf16.msra.mxu1 %v5557_v29  ;;  %478 = vmatmul.mubr.f32.vlgmr.msra.gmra.mrb[0].mxu0 %v477_v40  ;;  %v6595_v29 = vand.u32 4294901760, %v334_v13  ;;  %v6597_v23 = vand.u32 4294901760, %v333_v5  ;;  %v5571_v10 = vpack.c.bf16 %v6291_v43, %v6289_v42  ;;  %v6602_v59 = vand.u32 4294901760, %v336_v46 }
  0x4a   : > { %v5559_v35 = vpack.c.bf16 %v750_v6, %v743_v24  ;;  %5566 = vmatpush3.bf16.msra.mxu0 %v5565_v60  ;;  %v631_v63 = vand.u32 4294901760, %v630_v53  ;;  %v638_v8 = vand.u32 4294901760, %v637_v32  ;;  %v338_v24 = vld [vmem:[%s6494_s29 + $0x38] sm:$0xff]  ;;  %v337_v53 = vld [vmem:[%s6494_s29 + $0x30] sm:$0xff]  ;;  %v6615_v49 = vand.u32 4294901760, %v335_v54 }
  0x4b   : > { %7556 = vst [vmem:[#allocation18_spill] sm:$0xff] %v6595_v29  ;;  %7557 = vst [vmem:[#allocation19_spill] sm:$0xff] %v6597_v23  ;;  %5568 = vmatprep.subr.bf16.mxu0 %v5567_v34  ;;  %v6606_v40 = vsub.f32 %v334_v13, %v6595_v29  ;;  %v6609_v60 = vsub.f32 %v333_v5, %v6597_v23  ;;  %v6613_v32 = vsub.f32 %v336_v46, %v6602_v59  ;;  %vm1902_vm2 = vcmask 64512  }
  0x4c   : > { %5560 = vmatprep.subr.bf16.mxu1 %v5559_v35  ;;  %v5561_v6 = vpack.c.bf16 %v638_v8, %v631_v63  ;;  %v5573_v34 = vpack.c.bf16 %v6320_v61, %v6318_v57  ;;  %v6621_v13 = vand.u32 4294901760, %v338_v24  ;;  %v5575_v5 = vpack.c.bf16 %v6345_v12, %v6343_v11 }
  0x4d   : > { %7558 = vst [vmem:[#allocation20_spill] sm:$0xff] %v6609_v60  ;;  %v7527_v35 = vand.u32 4294901760, %v6606_v40  ;;  %v7526_v63 = vand.u32 4294901760, %v6609_v60  ;;  %v7530_v46 = vand.u32 4294901760, %v6613_v32  ;;  %v6628_v8 = vsub.f32 %v335_v54, %v6615_v49 }
  0x4e   : > { %5562 = vmatpush3.bf16.msra.mxu1 %v5561_v6  ;;  %5570 = vmatpush3.bf16.msra.mxu0 %v5569_v41  ;;  %v6630_v41 = vand.u32 4294901760, %v337_v53  ;;  %vm2518_vm3 = vcmask 130048  }
  0x4f   : > { %5572 = vmatprep.subr.bf16.mxu0 %v5571_v10  ;;  %5596 = vmatprep.subr.bf16.mxu1 %v6239_v14  ;;  %v485_v6 = vsub.f32 %v6606_v40, %v7527_v35  ;;  %v491_v10 = vsub.f32 %v6609_v60, %v7526_v63  ;;  %v6639_v14 = vsub.f32 %v338_v24, %v6621_v13  ;;  %v7533_v52 = vand.u32 4294901760, %v6628_v8 }
  0x50   : > { %v500_v54 = vsub.f32 %v6613_v32, %v7530_v46  ;;  %v6647_v18 = vsub.f32 %v337_v53, %v6630_v41  ;;  %v5577_v63 = vpack.c.bf16 %v6365_v48, %v6361_v36  ;;  %v5579_v46 = vpack.c.bf16 %v6387_v0, %v6380_v55 }
  0x51   : > { %755 = vmatmul.mubr.f32.vlgmr.msra.gmra.mrb[0].mxu1 %v6540_v17  ;;  %v486_v35 = vand.u32 4294901760, %v485_v6  ;;  %v492_v24 = vand.u32 4294901760, %v491_v10  ;;  %v7536_v60 = vand.u32 4294901760, %v6639_v14  ;;  %v506_v53 = vsub.f32 %v6628_v8, %v7533_v52 }
  0x52   : > { %5574 = vmatpush3.bf16.msra.mxu0 %v5573_v34  ;;  %5598 = vmatpush3.bf16.msra.mxu1 %v6249_v20  ;;  %v7537_v34 = vand.u32 4294901760, %v6647_v18  ;;  %v501_v17 = vand.u32 4294901760, %v500_v54  ;;  %v7559_v54 = vand.u32 4294901760, %v6269_v30  ;;  %v7560_v52 = vand.u32 4294901760, %v6271_v31 }
  0x53   : > { %5576 = vmatprep.subr.bf16.mxu0 %v5575_v5  ;;  %5600 = vmatprep.subr.bf16.mxu1 %v6253_v22  ;;  %v515_v6 = vsub.f32 %v6639_v14, %v7536_v60  ;;  %v507_v5 = vand.u32 4294901760, %v506_v53  ;;  %v7562_v53 = vand.u32 4294901760, %v6251_v21  ;;  %v7565_v30 = vand.u32 4294901760, %v6279_v37 }
  0x54   : > { %487 = vmatprep.mubr.f32.mxu0 %v486_v35  ;;  %760 = vmatprep.mubr.f32.mxu1 %v6595_v29  ;;  %v521_v10 = vsub.f32 %v6647_v18, %v7537_v34  ;;  %v5581_v35 = vpack.c.bf16 %v6408_v50, %v6404_v28  ;;  %v5627_v29 = vpack.c.bf16 %v7560_v52, %v7559_v54  ;;  %v7563_v34 = vand.u32 4294901760, %v6262_v25 }
  0x55   : > { %493 = vmatmul.mubr.f32.gmra.mrb[2].mxu0 %v492_v24  ;;  %762 = vmatmul.mubr.f32.gmra.mrb[2].mxu1 %v6597_v23  ;;  %v7561_v24 = vand.u32 4294901760, %v6241_v15  ;;  %v7564_v23 = vand.u32 4294901760, %v6264_v26  ;;  %v7566_v31 = vand.u32 4294901760, %v6281_v38  ;;  %v5585_v15 = vpack.c.bf16 %v6455_v9, %v6451_v4 }
  0x56   : > { %5578 = vmatpush3.bf16.msra.mxu0 %v5577_v63  ;;  %5602 = vmatpush3.bf16.msra.mxu1 %v6266_v27  ;;  %v5583_v63 = vpack.c.bf16 %v6430_v19, %v6423_v51  ;;  %v516_v21 = vand.u32 4294901760, %v515_v6  ;;  %v7568_v54 = vand.u32 4294901760, %v6291_v43  ;;  %v7569_v26 = vand.u32 4294901760, %v6318_v57 }
  0x57   : > { %v5629_v60 = vpack.c.bf16 %v7562_v53, %v7561_v24  ;;  %5580 = vmatprep.subr.bf16.mxu0 %v5579_v46  ;;  %5604 = vmatprep.subr.bf16.mxu1 %v6283_v39  ;;  %v5631_v27 = vpack.c.bf16 %v7564_v23, %v7563_v34  ;;  %v5633_v52 = vpack.c.bf16 %v7566_v31, %v7565_v30  ;;  %v7567_v46 = vand.u32 4294901760, %v6289_v42 }
  0x58   : > { %502 = vmatprep.mubr.f32.mxu0 %v501_v17  ;;  %767 = vmatprep.mubr.f32.mxu1 %v6602_v59  ;;  %v7570_v23 = vand.u32 4294901760, %v6320_v61  ;;  %v522_v38 = vand.u32 4294901760, %v521_v10  ;;  %v7571_v34 = vand.u32 4294901760, %v6343_v11  ;;  %v7572_v17 = vand.u32 4294901760, %v6345_v12 }
  0x59   : > { %v5635_v25 = vpack.c.bf16 %v7568_v54, %v7567_v46  ;;  %508 = vmatmul.mubr.f32.gmra.mrb[4].mxu0 %v507_v5  ;;  %769 = vmatmul.mubr.f32.gmra.mrb[4].mxu1 %v6615_v49  ;;  %v7573_v24 = vand.u32 4294901760, %v6361_v36  ;;  %v7574_v42 = vand.u32 4294901760, %v6365_v48  ;;  %v7575_v53 = vand.u32 4294901760, %v6380_v55  ;;  %v7590_v46 = vld [vmem:[#allocation10_spill] sm:$0xff]  ;;  %v7592_v54 = vld [vmem:[#allocation20_spill] sm:$0xff] }
  0x5a   : > { %v5637_v37 = vpack.c.bf16 %v7570_v23, %v7569_v26  ;;  %v5639_v6 = vpack.c.bf16 %v7572_v17, %v7571_v34  ;;  %v7576_v57 = vand.u32 4294901760, %v6387_v0  ;;  %5582 = vmatpush3.bf16.msra.mxu0 %v5581_v35  ;;  %5606 = vmatpush3.bf16.msra.mxu1 %v6294_v45  ;;  %v7577_v5 = vand.u32 4294901760, %v6404_v28  ;;  %v7586_v35 = vld [vmem:[#allocation7_spill] sm:$0xff]  ;;  %v7593_v26 = vld [vmem:[#allocation12_spill] sm:$0xff]  ;;  %v7594_v23 = vld [vmem:[#allocation5_spill] sm:$0xff] }
  0x5b   : > { %v5641_v43 = vpack.c.bf16 %v7574_v42, %v7573_v24  ;;  %v7578_v11 = vand.u32 4294901760, %v6408_v50  ;;  %v7579_v12 = vand.u32 4294901760, %v6423_v51  ;;  %v7580_v36 = vand.u32 4294901760, %v6430_v19  ;;  %5584 = vmatprep.subr.bf16.mxu0 %v5583_v63  ;;  %5608 = vmatprep.subr.bf16.mxu1 %v6322_v62  ;;  %v7584_v50 = vld [vmem:[#allocation13_spill] sm:$0xff]  ;;  %v7585_v51 = vld [vmem:[#allocation16_spill] sm:$0xff] }
  0x5c   : > { %v5643_v61 = vpack.c.bf16 %v7576_v57, %v7575_v53  ;;  %v7581_v48 = vand.u32 4294901760, %v6451_v4  ;;  %v7582_v55 = vand.u32 4294901760, %v6455_v9  ;;  %v5587_v0 = vpack.c.bf16 %v6478_v1, %v6471_v2  ;;  %517 = vmatprep.mubr.f32.mxu0 %v516_v21  ;;  %774 = vmatprep.mubr.f32.mxu1 %v6621_v13  ;;  %v7587_v63 = vld [vmem:[#allocation8_spill] sm:$0xff]  ;;  %v7589_v21 = vld [vmem:[#allocation17_spill] sm:$0xff] }
  0x5d   : > { %v5645_v10 = vpack.c.bf16 %v7578_v11, %v7577_v5  ;;  %v5647_v30 = vpack.c.bf16 %v7580_v36, %v7579_v12  ;;  %523 = vmatmul.mubr.f32.gmra.mrb[6].mxu0 %v522_v38  ;;  %776 = vmatmul.mubr.f32.gmra.mrb[6].mxu1 %v6630_v41  ;;  %v5589_v19 = vpack.c.bf16 %v6503_v44, %v6499_v7  ;;  %v7583_v28 = vand.u32 4294901760, %v6538_v58 }
  0x5e   : > { %v5649_v31 = vpack.c.bf16 %v7582_v55, %v7581_v48  ;;  %5586 = vmatpush3.bf16.msra.mxu0 %v5585_v15  ;;  %5610 = vmatpush3.bf16.msra.mxu1 %v6347_v16  ;;  %v5591_v9 = vpack.c.bf16 %v6517_v56, %v6513_v33  ;;  %v5593_v4 = vpack.c.bf16 %v7585_v51, %v7584_v50  ;;  %v7588_v15 = vld [vmem:[#allocation9_spill] sm:$0xff] }
  0x5f   : > { %5588 = vmatprep.subr.bf16.mxu0 %v5587_v0  ;;  %5612 = vmatprep.subr.bf16.mxu1 %v6363_v47 }
  0x60   : > { %911 = vmatprep.mubr.f32.mxu0 %v6538_v58  ;;  %1045 = vmatprep.mubr.f32.mxu1 %v7583_v28  ;;  %v7591_v58 = vld [vmem:[#allocation11_spill] sm:$0xff] }
  0x62   : > { %5590 = vmatpush3.bf16.msra.mxu0 %v5589_v19  ;;  %5614 = vmatpush3.bf16.msra.mxu1 %v6389_v3 }
  0x63   : > { %5592 = vmatprep.subr.bf16.mxu0 %v5591_v9  ;;  %5616 = vmatprep.subr.bf16.mxu1 %v7586_v35 }
  0x66   : > { %5594 = vmatpush3.bf16.msra.mxu0 %v5593_v4  ;;  %5618 = vmatpush3.bf16.msra.mxu1 %v7587_v63 }
  0x67   : > { %5620 = vmatprep.subr.bf16.mxu1 %v7588_v15  ;;  %5628 = vmatprep.subr.bf16.mxu0 %v5627_v29  ;;  %v7595_v29 = vand.u32 4294901760, %v7589_v21 }
  0x69   : > { %914 = vmatmul.mubr.f32.vlgmr.msra.gmra.mrb[8].mxu0 %v7589_v21 }
  0x6a   : > { %5622 = vmatpush3.bf16.msra.mxu1 %v7590_v46  ;;  %5630 = vmatpush3.bf16.msra.mxu0 %v5629_v60  ;;  %v7597_v60 = vand.u32 4294901760, %v7592_v54 }
  0x6b   : > { %920 = vmatprep.mubr.f32.mxu0 %v6606_v40  ;;  %5624 = vmatprep.subr.bf16.mxu1 %v7591_v58 }
  0x6c   : > { %5632 = vmatprep.subr.bf16.mxu0 %v5631_v27  ;;  %v7596_v27 = vand.u32 4294901760, %v6606_v40  ;;  %v7601_v40 = vand.u32 4294901760, %v6628_v8 }
  0x6d   : > { %923 = vmatmul.mubr.f32.gmra.mrb[10].mxu0 %v7592_v54 }
  0x6e   : > { %5626 = vmatpush3.bf16.msra.mxu1 %v7593_v26  ;;  %5634 = vmatpush3.bf16.msra.mxu0 %v5633_v52  ;;  %v7598_v52 = vld [vmem:[#allocation6_spill] sm:$0xff] }
  0x6f   : > { %929 = vmatprep.mubr.f32.mxu0 %v6613_v32  ;;  %5636 = vmatprep.subr.bf16.mxu0 %v5635_v25  ;;  %v7599_v25 = vand.u32 4294901760, %v6613_v32  ;;  %v7604_v32 = vand.u32 4294901760, %v6478_v1  ;;  %v7609_v1 = vand.u32 4294901760, %v6517_v56  ;;  %v6102_v56 = vmov 0.0|0.0  }
  0x70   : > { %5660 = vmatprep.subr.bf16.mxu1 %v7594_v23 }
  0x71   : > { %932 = vmatmul.mubr.f32.gmra.mrb[12].mxu0 %v6628_v8  ;;  %1049 = vmatmul.mubr.f32.vlgmr.msra.gmra.mrb[8].mxu1 %v7595_v29  ;;  %v7606_v8 = vand.u32 4294901760, %v6499_v7 }
  0x72   : > { %5638 = vmatpush3.bf16.msra.mxu0 %v5637_v37  ;;  %5662 = vmatpush3.bf16.msra.mxu1 %v6249_v20  ;;  %v7600_v20 = vld [vmem:[#allocation14_spill] sm:$0xff]  ;;  %v7603_v37 = vand.u32 4294901760, %v6471_v2  ;;  %v7608_v2 = vand.u32 4294901760, %v6513_v33  ;;  %v6101_v33 = vmov 0  }
  0x73   : > { %938 = vmatprep.mubr.f32.mxu0 %v6639_v14  ;;  %1056 = vmatprep.mubr.f32.mxu1 %v7596_v27 }
  0x74   : > { %5640 = vmatprep.subr.bf16.mxu0 %v5639_v6  ;;  %5664 = vmatprep.subr.bf16.mxu1 %v6253_v22  ;;  %v7602_v22 = vand.u32 4294901760, %v6639_v14  ;;  %v5651_v38 = vpack.c.bf16 %v7604_v32, %v7603_v37  ;;  %v5655_v34 = vpack.c.bf16 %v7609_v1, %v7608_v2 }
  0x75   : > { %941 = vmatmul.mubr.f32.gmra.mrb[14].mxu0 %v6647_v18  ;;  %1060 = vmatmul.mubr.f32.gmra.mrb[10].mxu1 %v7597_v60 }
  0x76   : > { %5642 = vmatpush3.bf16.msra.mxu0 %v5641_v43  ;;  %5666 = vmatpush3.bf16.msra.mxu1 %v7598_v52 }
  0x77   : > { %1067 = vmatprep.mubr.f32.mxu1 %v7599_v25  ;;  %5644 = vmatprep.subr.bf16.mxu0 %v5643_v61 }
  0x78   : > { %5668 = vmatprep.subr.bf16.mxu1 %v6283_v39  ;;  %1248 = vmatprep.mubr.f32.mxu0 %v7600_v20  ;;  %v7605_v39 = vand.u32 4294901760, %v6647_v18  ;;  %v1402_v18 = vld [vmem:[%s7464_s3] sm:$0xff] }
  0x79   : > { %1071 = vmatmul.mubr.f32.gmra.mrb[12].mxu1 %v7601_v40  ;;  %6007 = vset.pattern.permute.xlu0 %v6101_v33 }
  0x7a   : > { %5646 = vmatpush3.bf16.msra.mxu0 %v5645_v10  ;;  %5670 = vmatpush3.bf16.msra.mxu1 %v6294_v45  ;;  %v7607_v45 = vand.u32 4294901760, %v6503_v44  ;;  %v7612_v44 = vld [vmem:[#allocation15_spill] sm:$0xff] }
  0x7b   : > { %1078 = vmatprep.mubr.f32.mxu1 %v7602_v22  ;;  %5648 = vmatprep.subr.bf16.mxu0 %v5647_v30 }
  0x7c   : > { %5672 = vmatprep.subr.bf16.mxu1 %v6322_v62  ;;  %v5653_v14 = vpack.c.bf16 %v7607_v45, %v7606_v8  ;;  %v7610_v62 = vand.u32 4294901760, %v7584_v50  ;;  %6008 = vset.pattern.permute.xlu1 %v6101_v33 }
  0x7d   : > { %1082 = vmatmul.mubr.f32.gmra.mrb[14].mxu1 %v7605_v39  ;;  %1405 = vperm.xlu0 %6007, %v1402_v18  }
  0x7e   : > { %5650 = vmatpush3.bf16.msra.mxu0 %v5649_v31  ;;  %5674 = vmatpush3.bf16.msra.mxu1 %v6347_v16  ;;  %v7611_v16 = vand.u32 4294901760, %v7585_v51 }
  0x7f   : > { %5652 = vmatprep.subr.bf16.mxu0 %v5651_v38  ;;  %5676 = vmatprep.subr.bf16.mxu1 %v6363_v47  ;;  %v7613_v47 = vld [vmem:[#allocation18_spill] sm:$0xff] }
  0x80   : > { %1373 = vmatprep.mubr.f32.mxu1 %v7600_v20  ;;  %v5657_v7 = vpack.c.bf16 %v7611_v16, %v7610_v62 }
  0x82   : > { %5654 = vmatpush3.bf16.msra.mxu0 %v5653_v14  ;;  %5678 = vmatpush3.bf16.msra.mxu1 %v6389_v3  ;;  %v7614_v3 = vld [vmem:[#allocation19_spill] sm:$0xff] }
  0x83   : > { %5656 = vmatprep.subr.bf16.mxu0 %v5655_v34  ;;  %5680 = vmatprep.subr.bf16.mxu1 %v7586_v35 }
  0x86   : > { %5658 = vmatpush3.bf16.msra.mxu0 %v5657_v7  ;;  %5682 = vmatpush3.bf16.msra.mxu1 %v7587_v63 }
  0x87   : > { %5684 = vmatprep.subr.bf16.mxu1 %v7588_v15  ;;  %5697 = vmatprep.subr.bf16.mxu0 %v6102_v56 }
  0x89   : > { %1250 = vmatmul.mubr.f32.vlgmr.msra.gmra.mrb[16].mxu0 %v7612_v44 }
  0x8a   : > { %5686 = vmatpush3.bf16.msra.mxu1 %v7590_v46  ;;  %1255 = vmatprep.mubr.f32.mxu0 %v7613_v47 }
  0x8b   : > { %5688 = vmatprep.subr.bf16.mxu1 %v7591_v58 }
  0x8d   : > { %1257 = vmatmul.mubr.f32.gmra.mrb[18].mxu0 %v7614_v3 }
  0x8e   : > { %5690 = vmatpush3.bf16.msra.mxu1 %v7593_v26  ;;  %1262 = vmatprep.mubr.f32.mxu0 %v6602_v59 }
  0x8f   : > { %5691 = vmatprep.subr.bf16.mxu1 %v6102_v56 }
  0x91   : > { %1264 = vmatmul.mubr.f32.gmra.mrb[20].mxu0 %v6615_v49  ;;  %1375 = vmatmul.mubr.f32.vlgmr.msra.gmra.mrb[16].mxu1 %v7612_v44 }
  0x92   : > { %1269 = vmatprep.mubr.f32.mxu0 %v6621_v13  ;;  %1380 = vmatprep.mubr.f32.mxu1 %v7613_v47 }
  0x95   : > { %1271 = vmatmul.mubr.f32.gmra.mrb[22].mxu0 %v6630_v41  ;;  %1382 = vmatmul.mubr.f32.gmra.mrb[18].mxu1 %v7614_v3 }
  0x96   : > { %1387 = vmatprep.mubr.f32.mxu1 %v6602_v59  ;;  %v6104_v59 = vmov 0.0  }
  0x97   : > { %5320 = vmatprep.mubr.msk.f32.mxu0 %vm6103_vm0, %v6104_v59 }
  0x99   : > { %1389 = vmatmul.mubr.f32.gmra.mrb[20].mxu1 %v6615_v49 }
  0x9a   : > { %1394 = vmatprep.mubr.f32.mxu1 %v6621_v13 }
  0x9d   : > { %1396 = vmatmul.mubr.f32.gmra.mrb[22].mxu1 %v6630_v41 }
  0x9e   : > { %5309 = vmatprep.mubr.msk.f32.mxu1 %vm6103_vm0, %v6104_v59 }
 0x11c   : > { %v4961_v49 = vpop.f32.mrb[0].mxu0 }
 0x11d   : > { %v4962_v13 = vpop.f32.mrb[1].mxu0 }
 0x11e   : > { %v4963_v41 = vadd.f32 %v4962_v13, %v4961_v49 }
 0x124   : > { %v5005_v17 = vpop.f32.mrb[0].mxu1 }
 0x125   : > { %v5006_v6 = vpop.f32.mrb[1].mxu1 }
 0x126   : > { %v5007_v24 = vadd.f32 %v5006_v6, %v5005_v17 }
 0x128   : > { %v757_v42 = vadd.f32 %v5007_v24, %v4963_v41  ;;  %v4964_v43 = vpop.f32.mrb[2].mxu0  ;;  %v5008_v53 = vpop.f32.mrb[2].mxu1 }
 0x129   : > { %v4965_v57 = vpop.f32.mrb[3].mxu0  ;;  %v5009_v61 = vpop.f32.mrb[3].mxu1 }
 0x12a   : > { %v4966_v5 = vadd.f32 %v4965_v57, %v4964_v43  ;;  %v5010_v11 = vadd.f32 %v5009_v61, %v5008_v53 }
 0x12c   : > { %v764_v10 = vadd.f32 %v5010_v11, %v4966_v5  ;;  %v4967_v12 = vpop.f32.mrb[4].mxu0  ;;  %v5011_v36 = vpop.f32.mrb[4].mxu1 }
 0x12d   : > { %v4968_v30 = vpop.f32.mrb[5].mxu0  ;;  %v5012_v48 = vpop.f32.mrb[5].mxu1 }
 0x12e   : > { %v4969_v55 = vadd.f32 %v4968_v30, %v4967_v12  ;;  %v5013_v31 = vadd.f32 %v5012_v48, %v5011_v36 }
 0x130   : > { %v4970_v0 = vpop.f32.mrb[6].mxu0  ;;  %v771_v19 = vadd.f32 %v5013_v31, %v4969_v55  ;;  %v5014_v9 = vpop.f32.mrb[6].mxu1  ;;  %v1401_v55 = vld [vmem:[%s7463_s2] sm:$0xff] }
 0x131   : > { %v4971_v28 = vpop.f32.mrb[7].mxu0  ;;  %v5015_v50 = vpop.f32.mrb[7].mxu1 }
 0x132   : > { %v4972_v51 = vadd.f32 %v4971_v28, %v4970_v0  ;;  %v5016_v4 = vadd.f32 %v5015_v50, %v5014_v9 }
 0x134   : > { %v778_v35 = vadd.f32 %v5016_v4, %v4972_v51  ;;  %v1410_v4 = vsel %vm1408_vm1, %v1401_v55, 0 }
 0x13c   : > { %v5049_v63 = vpop.f32.mrb[8].mxu0 }
 0x13d   : > { %v5050_v15 = vpop.f32.mrb[9].mxu0 }
 0x13e   : > { %v5051_v21 = vadd.f32 %v5050_v15, %v5049_v63 }
 0x140   : > { %v916_v46 = vadd.f32 %v5051_v21, %v757_v42  ;;  %v5052_v58 = vpop.f32.mrb[10].mxu0 }
 0x141   : > { %v5053_v54 = vpop.f32.mrb[11].mxu0 }
 0x142   : > { %v5054_v26 = vadd.f32 %v5053_v54, %v5052_v58 }
 0x144   : > { %v925_v23 = vadd.f32 %v5054_v26, %v764_v10  ;;  %v5055_v29 = vpop.f32.mrb[12].mxu0  ;;  %v5093_v27 = vpop.f32.mrb[8].mxu1 }
 0x145   : > { %v5056_v60 = vpop.f32.mrb[13].mxu0  ;;  %v5094_v52 = vpop.f32.mrb[9].mxu1 }
 0x146   : > { %v5057_v25 = vadd.f32 %v5056_v60, %v5055_v29  ;;  %v5095_v20 = vadd.f32 %v5094_v52, %v5093_v27 }
 0x148   : > { %v934_v40 = vadd.f32 %v5057_v25, %v771_v19  ;;  %v1051_v22 = vadd.f32 %v5095_v20, %v916_v46  ;;  %v5058_v37 = vpop.f32.mrb[14].mxu0  ;;  %v5096_v32 = vpop.f32.mrb[10].mxu1  ;;  %v6834_v46 = vand.u32 4294901760, %v1410_v4 }
 0x149   : > { %v5059_v38 = vpop.f32.mrb[15].mxu0  ;;  %v5097_v39 = vpop.f32.mrb[11].mxu1 }
 0x14a   : > { %v5060_v8 = vadd.f32 %v5059_v38, %v5058_v37  ;;  %v5098_v45 = vadd.f32 %v5097_v39, %v5096_v32  ;;  %v1482_v27 = vsub.f32 %v1410_v4, %v6834_v46 }
 0x14c   : > { %v943_v14 = vadd.f32 %v5060_v8, %v778_v35  ;;  %v1062_v2 = vadd.f32 %v5098_v45, %v925_v23  ;;  %v5099_v1 = vpop.f32.mrb[12].mxu1 }
 0x14d   : > { %v5100_v34 = vpop.f32.mrb[13].mxu1 }
 0x14e   : > { %v5101_v62 = vadd.f32 %v5100_v34, %v5099_v1 }
 0x150   : > { %v1073_v16 = vadd.f32 %v5101_v62, %v934_v40  ;;  %v5102_v7 = vpop.f32.mrb[14].mxu1 }
 0x151   : > { %v5103_v44 = vpop.f32.mrb[15].mxu1 }
 0x152   : > { %v5104_v47 = vadd.f32 %v5103_v44, %v5102_v7 }
 0x154   : > { %v1084_v3 = vadd.f32 %v5104_v47, %v943_v14 }
 0x15c   : > { %v5137_v18 = vpop.f32.mrb[16].mxu0 }
 0x15d   : > { %v5138_v33 = vpop.f32.mrb[17].mxu0 }
 0x15e   : > { %v5139_v49 = vadd.f32 %v5138_v33, %v5137_v18 }
 0x160   : > { %v1252_v13 = vadd.f32 %v5139_v49, %v1051_v22  ;;  %v5140_v41 = vpop.f32.mrb[18].mxu0  ;;  %v1483_v22 = vand.u32 4294901760, %v1482_v27 }
 0x161   : > { %v5141_v17 = vpop.f32.mrb[19].mxu0 }
 0x162   : > { %v5142_v6 = vadd.f32 %v5141_v17, %v5140_v41  ;;  %v1484_v8 = vsub.f32 %v1482_v27, %v1483_v22  ;;  %v1898_v17 = vld [vmem:[%s7465_s4] sm:$0xff] }
 0x164   : > { %v1259_v24 = vadd.f32 %v5142_v6, %v1062_v2  ;;  %v5143_v42 = vpop.f32.mrb[20].mxu0  ;;  %v5181_v43 = vpop.f32.mrb[16].mxu1  ;;  %v1485_v7 = vand.u32 4294901760, %v1484_v8  ;;  %v1904_v6 = vsel %vm1902_vm2, %v1898_v17, 0  ;;  %v2516_v8 = vld [vmem:[%s7467_s6 + $0x10] sm:$0xff] }
 0x165   : > { %v5144_v53 = vpop.f32.mrb[21].mxu0  ;;  %v5182_v57 = vpop.f32.mrb[17].mxu1 }
 0x166   : > { %v5145_v61 = vadd.f32 %v5144_v53, %v5143_v42  ;;  %v5183_v5 = vadd.f32 %v5182_v57, %v5181_v43 }
 0x168   : > { %v1266_v11 = vadd.f32 %v5145_v61, %v1073_v16  ;;  %v1377_v10 = vadd.f32 %v5183_v5, %v1252_v13  ;;  %v5146_v12 = vpop.f32.mrb[22].mxu0  ;;  %v5184_v36 = vpop.f32.mrb[18].mxu1  ;;  %v1899_v5 = vld [vmem:[%s7465_s4 + $0x8] sm:$0xff] }
 0x169   : > { %v5147_v30 = vpop.f32.mrb[23].mxu0  ;;  %v5185_v48 = vpop.f32.mrb[19].mxu1 }
 0x16a   : > { %v1413_v31 = vand.u32 4294901760, %v1377_v10  ;;  %v5148_v0 = vadd.f32 %v5147_v30, %v5146_v12  ;;  %v5186_v19 = vadd.f32 %v5185_v48, %v5184_v36  ;;  %3843 = vrot.lane.b32.xlu0 %v1377_v10, %s6105_s22  ;;  %v1901_v36 = vld [vmem:[%s7465_s4 + $0x18] sm:$0xff] }
 0x16b   : > { %v1913_v55 = vsel %vm1902_vm2, %v1901_v36, 0 }
 0x16c   : > { %v1493_v9 = vsub.f32 %v1377_v10, %v1413_v31  ;;  %v1273_v28 = vadd.f32 %v5148_v0, %v1084_v3  ;;  %v1384_v50 = vadd.f32 %v5186_v19, %v1259_v24  ;;  %v5187_v51 = vpop.f32.mrb[20].mxu1  ;;  %v6865_v24 = vand.u32 4294901760, %v1904_v6 }
 0x16d   : > { %v5188_v35 = vpop.f32.mrb[21].mxu1  ;;  %v1907_v10 = vsel %vm1902_vm2, %v1899_v5, 0  ;;  %v2011_v0 = vand.u32 4294901760, %v1913_v55 }
 0x16e   : > { %v1494_v63 = vand.u32 4294901760, %v1493_v9  ;;  %v1416_v15 = vand.u32 4294901760, %v1384_v50  ;;  %v5189_v21 = vadd.f32 %v5188_v35, %v5187_v51  ;;  %3845 = vrot.lane.b32.xlu1 %v1384_v50, %s6105_s22  ;;  %v1982_v42 = vsub.f32 %v1904_v6, %v6865_v24 }
 0x16f   : > { %v1991_v30 = vand.u32 4294901760, %v1907_v10  ;;  %v2012_v51 = vsub.f32 %v1913_v55, %v2011_v0 }
 0x170   : > { %v1500_v58 = vsub.f32 %v1384_v50, %v1416_v15  ;;  %v1391_v54 = vadd.f32 %v5189_v21, %v1266_v11  ;;  %v5190_v26 = vpop.f32.mrb[22].mxu1  ;;  %v5692_v23 = vpack.c.bf16 %v1416_v15, %v1413_v31  ;;  %v1495_v20 = vsub.f32 %v1493_v9, %v1494_v63  ;;  %v1900_v11 = vld [vmem:[%s7465_s4 + $0x10] sm:$0xff] }
 0x171   : > { %v5191_v29 = vpop.f32.mrb[23].mxu1  ;;  %v1983_v43 = vand.u32 4294901760, %v1982_v42  ;;  %v1910_v12 = vsel %vm1902_vm2, %v1900_v11, 0  ;;  %v1992_v31 = vsub.f32 %v1907_v10, %v1991_v30 }
 0x172   : > { %v1501_v60 = vand.u32 4294901760, %v1500_v58  ;;  %v1419_v52 = vand.u32 4294901760, %v1391_v54  ;;  %v5192_v25 = vadd.f32 %v5191_v29, %v5190_v26  ;;  %3847 = vrot.lane.b32.xlu1 %v1391_v54, %s6105_s22  ;;  %5693 = vmatpush3.bf16.msra.mxu1 %v5692_v23  ;;  %v5704_v40 = vpack.c.bf16 %v1500_v58, %v1493_v9  ;;  %v1406_v9 = vpop.permute.xlu0 %1405 }
 0x173   : > { %5694 = vmatprep.subr.bf16.mxu1 %v6102_v56  ;;  %v1496_v2 = vand.u32 4294901760, %v1495_v20  ;;  %v1984_v53 = vsub.f32 %v1982_v42, %v1983_v43  ;;  %v2001_v48 = vand.u32 4294901760, %v1910_v12  ;;  %v1993_v50 = vand.u32 4294901760, %v1992_v31 }
 0x174   : > { %v1507_v37 = vsub.f32 %v1391_v54, %v1419_v52  ;;  %v1398_v32 = vadd.f32 %v5192_v25, %v1273_v28  ;;  %v1502_v38 = vsub.f32 %v1500_v58, %v1501_v60  ;;  %v5716_v39 = vpack.c.bf16 %v1501_v60, %v1494_v63 }
 0x175   : > { %v1985_v57 = vand.u32 4294901760, %v1984_v53  ;;  %v2002_v19 = vsub.f32 %v1910_v12, %v2001_v48  ;;  %v1994_v21 = vsub.f32 %v1992_v31, %v1993_v50 }
 0x176   : > { %v1508_v45 = vand.u32 4294901760, %v1507_v37  ;;  %v1422_v14 = vand.u32 4294901760, %v1398_v32  ;;  %3849 = vrot.lane.b32.xlu0 %v1398_v32, %s6105_s22  ;;  %v1503_v1 = vand.u32 4294901760, %v1502_v38 }
 0x177   : > { %v2003_v4 = vand.u32 4294901760, %v2002_v19 }
 0x178   : > { %v1514_v34 = vsub.f32 %v1398_v32, %v1422_v14  ;;  %v5695_v62 = vpack.c.bf16 %v1422_v14, %v1419_v52  ;;  %v5698_v16 = vpack.c.bf16 %v1503_v1, %v1496_v2  ;;  %v1509_v47 = vsub.f32 %v1507_v37, %v1508_v45 }
 0x179   : > { %v2004_v58 = vsub.f32 %v2002_v19, %v2003_v4  ;;  %v2537_v14 = vand.u32 4294901760, %v2516_v8 }
 0x17a   : > { %v1515_v44 = vand.u32 4294901760, %v1514_v34  ;;  %5696 = vmatpush3.bf16.msra.mxu1 %v5695_v62  ;;  %5699 = vmatpush3.bf16.msra.mxu0 %v5698_v16  ;;  %v5707_v3 = vpack.c.bf16 %v1514_v34, %v1507_v37  ;;  %v1510_v49 = vand.u32 4294901760, %v1509_v47  ;;  %v2517_v37 = vld [vmem:[%s7467_s6 + $0x18] sm:$0xff] }
 0x17b   : > { %5700 = vmatprep.subr.bf16.mxu0 %v6102_v56  ;;  %v2535_v38 = vand.u32 4294901760, %v2517_v37 }
 0x17c   : > { %v1516_v18 = vsub.f32 %v1514_v34, %v1515_v44  ;;  %v5719_v33 = vpack.c.bf16 %v1515_v44, %v1508_v45 }
 0x17d   : > { %5310 = vmatmul.mubr.f32.vlgmr.msra.gmra.mrb[24].mxu1 %v1485_v7  ;;  %v2657_v1 = vsub.f32 %v2517_v37, %v2535_v38 }
 0x17e   : > { %v1517_v13 = vand.u32 4294901760, %v1516_v18  ;;  %5369 = vmatprep.mubr.f32.mxu1 %v1985_v57 }
 0x17f   : > { %v2658_v7 = vand.u32 4294901760, %v2657_v1 }
 0x180   : > { %v5701_v41 = vpack.c.bf16 %v1517_v13, %v1510_v49 }
 0x181   : > { %v2659_v18 = vsub.f32 %v2657_v1, %v2658_v7 }
 0x182   : > { %5702 = vmatpush3.bf16.msra.mxu0 %v5701_v41 }
 0x183   : > { %5703 = vmatprep.subr.bf16.mxu0 %v6102_v56  ;;  %v2660_v41 = vand.u32 4294901760, %v2659_v18 }
 0x185   : > { %5321 = vmatmul.mubr.f32.vlgmr.msra.gmra.mrb[24].mxu0 %v6834_v46 }
 0x186   : > { %5705 = vmatpush3.bf16.msra.mxu0 %v5704_v40  ;;  %5331 = vmatprep.mubr.msk.f32.mxu0 %vm6103_vm0, %v6104_v59 }
 0x187   : > { %5706 = vmatprep.subr.bf16.mxu0 %v6102_v56 }
 0x18a   : > { %5708 = vmatpush3.bf16.msra.mxu0 %v5707_v3 }
 0x18b   : > { %5709 = vmatprep.subr.bf16.mxu0 %v6102_v56 }
 0x18d   : > { %5332 = vmatmul.mubr.f32.vlgmr.msra.gmra.mrb[24].mxu0 %v1482_v27  ;;  %v2005_v27 = vand.u32 4294901760, %v2004_v58  ;;  %v3169_v58 = vld [vmem:[%s7468_s7] sm:$0xff] }
 0x18e   : > { %5711 = vmatpush3.bf16.msra.mxu0 %v5692_v23  ;;  %5342 = vmatprep.mubr.msk.f32.mxu0 %vm6103_vm0, %v6104_v59 }
 0x18f   : > { %5712 = vmatprep.subr.bf16.mxu0 %v6102_v56 }
 0x192   : > { %5714 = vmatpush3.bf16.msra.mxu0 %v5695_v62 }
 0x193   : > { %5715 = vmatprep.subr.bf16.mxu0 %v6102_v56 }
 0x195   : > { %5343 = vmatmul.mubr.f32.vlgmr.msra.gmra.mrb[24].mxu0 %v1483_v22  ;;  %v2515_v22 = vld [vmem:[%s7467_s6 + $0x8] sm:$0xff] }
 0x196   : > { %5717 = vmatpush3.bf16.msra.mxu0 %v5716_v39  ;;  %5353 = vmatprep.mubr.msk.f32.mxu0 %vm6103_vm0, %v6104_v59  ;;  %v2531_v32 = vand.u32 4294901760, %v2515_v22  ;;  %v2514_v39 = vld [vmem:[%s7467_s6] sm:$0xff] }
 0x197   : > { %5718 = vmatprep.subr.bf16.mxu0 %v6102_v56  ;;  %v2533_v45 = vand.u32 4294901760, %v2514_v39 }
 0x198   : > { %v2645_v2 = vsub.f32 %v2515_v22, %v2531_v32 }
 0x199   : > { %v6896_v34 = vsub.f32 %v2514_v39, %v2533_v45  ;;  %v6907_v53 = vpack.c.bf16 %v2537_v14, %v2533_v45 }
 0x19a   : > { %5720 = vmatpush3.bf16.msra.mxu0 %v5719_v33  ;;  %v2646_v16 = vand.u32 4294901760, %v2645_v2  ;;  %v5735_v57 = vpack.c.bf16 %v2657_v1, %v2645_v2 }
 0x19b   : > { %5721 = vmatprep.subr.bf16.mxu0 %v6102_v56  ;;  %v2652_v44 = vand.u32 4294901760, %v6896_v34 }
 0x19c   : > { %v2647_v3 = vsub.f32 %v2645_v2, %v2646_v16 }
 0x19d   : > { %5354 = vmatmul.mubr.f32.vlgmr.msra.gmra.mrb[24].mxu0 %v6834_v46  ;;  %v2653_v33 = vsub.f32 %v6896_v34, %v2652_v44 }
 0x19e   : > { %5723 = vmatpush3.bf16.msra.mxu0 %v5692_v23  ;;  %5364 = vmatprep.mubr.msk.f32.mxu0 %vm6103_vm0, %v6104_v59  ;;  %v1995_v23 = vand.u32 4294901760, %v1994_v21  ;;  %v2648_v13 = vand.u32 4294901760, %v2647_v3 }
 0x19f   : > { %5724 = vmatprep.subr.bf16.mxu0 %v6102_v56  ;;  %v2654_v17 = vand.u32 4294901760, %v2653_v33 }
 0x1a2   : > { %5726 = vmatpush3.bf16.msra.mxu0 %v5695_v62  ;;  %v6898_v62 = vsub.f32 %v2516_v8, %v2537_v14 }
 0x1a4   : > { %v2664_v47 = vand.u32 4294901760, %v6898_v62 }
 0x1a5   : > { %5365 = vmatmul.mubr.f32.vlgmr.msra.gmra.mrb[24].mxu0 %v6834_v46  ;;  %v2013_v46 = vand.u32 4294901760, %v2012_v51 }
 0x1a6   : > { %2728 = vmatprep.mubr.f32.mxu0 %v6104_v59  ;;  %v2665_v49 = vsub.f32 %v6898_v62, %v2664_v47  ;;  %v6914_v5 = vpack.c.bf16 %v2664_v47, %v2652_v44 }
 0x1a7   : > { %v2014_v29 = vsub.f32 %v2012_v51, %v2013_v46 }
 0x1a8   : > { %v2666_v6 = vand.u32 4294901760, %v2665_v49 }
 0x1a9   : > { %v2015_v52 = vand.u32 4294901760, %v2014_v29 }
 0x250   : > { %v1487_v56 = vpop.f32.mrb[24].mxu1 }
 0x251   : > { %v5311_v61 = vpop.f32.mrb[25].mxu1  ;;  %v1488_v28 = vadd.f32 %v1487_v56, %v1406_v9  ;;  %v5737_v56 = vpack.c.bf16 %v6898_v62, %v6896_v34 }
 0x252   : > { %v6912_v61 = vpack.c.bf16 %v2658_v7, %v2646_v16 }
 0x278   : > { %v1893_v35 = vpop.f32.mrb[24].mxu0 }
 0x279   : > { %v5824_v63 = vadd.f32 %v1893_v35, %v1488_v28  ;;  %v5366_v15 = vpop.f32.mrb[25].mxu0  ;;  %v3170_v35 = vld [vmem:[%s7468_s7 + $0x8] sm:$0xff] }
 0x27a   : > { %v3189_v21 = vand.u32 4294901760, %v3170_v35 }
 0x27b   : > { %v1897_v54 = vmax.f32 %v5824_v63, 0.0  ;;  %v3172_v63 = vld [vmem:[%s7468_s7 + $0x18] sm:$0xff] }
 0x27d   : > { %v1916_v26 = vand.u32 4294901760, %v1897_v54 }
 0x27f   : > { %v2023_v60 = vsub.f32 %v1897_v54, %v1916_v26  ;;  %5367 = vmatprep.subr.mxu1 %v1916_v26  ;;  %v3171_v54 = vld [vmem:[%s7468_s7 + $0x10] sm:$0xff] }
 0x280   : > { %5368 = vmatpush3.msra.mxu1 %v1916_v26  ;;  %v3195_v29 = vand.u32 4294901760, %v3171_v54 }
 0x281   : > { %5370 = vmatmul.mubr.f32.vlgmr.msra.gmra.mrb[26].mxu1 %v1995_v23  ;;  %v2024_v25 = vand.u32 4294901760, %v2023_v60  ;;  %v3191_v23 = vand.u32 4294901760, %v3169_v58 }
 0x282   : > { %5372 = vmatprep.mubr.f32.mxu1 %v2005_v27 }
 0x283   : > { %v2025_v20 = vsub.f32 %v2023_v60, %v2024_v25  ;;  %v6931_v27 = vsub.f32 %v3169_v58, %v3191_v23 }
 0x285   : > { %5373 = vmatmul.mubr.f32.gmra.mrb[28].mxu1 %v2015_v52  ;;  %v2026_v40 = vand.u32 4294901760, %v2025_v20  ;;  %v3310_v3 = vand.u32 4294901760, %v6931_v27 }
 0x286   : > { %5377 = vmatprep.mubr.f32.mxu1 %v6865_v24 }
 0x287   : > { %5375 = vmatprep.subr.mxu1 %v2026_v40 }
 0x288   : > { %5376 = vmatpush3.msra.mxu1 %v2026_v40  ;;  %v6937_v40 = vsub.f32 %v3170_v35, %v3189_v21  ;;  %v3844_v35 = vpop.permute.xlu0 %3843 }
 0x289   : > { %5378 = vmatmul.mubr.f32.vlgmr.msra.gmra.mrb[26].mxu1 %v1991_v30  ;;  %5383 = vmatprep.subr.mxu1 %v2023_v60 }
 0x28a   : > { %5384 = vmatpush3.msra.mxu1 %v2023_v60  ;;  %5380 = vmatprep.mubr.f32.mxu1 %v2001_v48  ;;  %v6933_v60 = vsub.f32 %v3171_v54, %v3195_v29  ;;  %v3304_v1 = vand.u32 4294901760, %v6937_v40 }
 0x28b   : > { %5391 = vmatprep.subr.mxu1 %v1916_v26 }
 0x28c   : > { %v3305_v49 = vsub.f32 %v6937_v40, %v3304_v1 }
 0x28d   : > { %5381 = vmatmul.mubr.f32.gmra.mrb[28].mxu1 %v2011_v0 }
 0x28e   : > { %5385 = vmatprep.mubr.f32.mxu1 %v1982_v42  ;;  %v5733_v42 = vpack.c.bf16 %v2666_v6, %v2654_v17  ;;  %v3322_v17 = vand.u32 4294901760, %v6933_v60  ;;  %v3306_v6 = vand.u32 4294901760, %v3305_v49 }
 0x291   : > { %5386 = vmatmul.mubr.f32.vlgmr.msra.gmra.mrb[26].mxu1 %v1992_v31 }
 0x292   : > { %5392 = vmatpush3.msra.mxu1 %v1916_v26  ;;  %5388 = vmatprep.mubr.f32.mxu1 %v2002_v19 }
 0x293   : > { %5399 = vmatprep.subr.mxu1 %v2024_v25 }
 0x295   : > { %5389 = vmatmul.mubr.f32.gmra.mrb[28].mxu1 %v2012_v51 }
 0x296   : > { %5393 = vmatprep.mubr.f32.mxu1 %v1983_v43  ;;  %v6904_v43 = vpack.c.bf16 %v2535_v38, %v2531_v32 }
 0x299   : > { %5394 = vmatmul.mubr.f32.vlgmr.msra.gmra.mrb[26].mxu1 %v1993_v50 }
 0x29a   : > { %5400 = vmatpush3.msra.mxu1 %v2024_v25  ;;  %5396 = vmatprep.mubr.f32.mxu1 %v2003_v4 }
 0x29b   : > { %5407 = vmatprep.subr.mxu1 %v1916_v26 }
 0x29d   : > { %5397 = vmatmul.mubr.f32.gmra.mrb[28].mxu1 %v2013_v46  ;;  %v3193_v46 = vand.u32 4294901760, %v3172_v63 }
 0x29e   : > { %5401 = vmatprep.mubr.f32.mxu1 %v6865_v24 }
 0x29f   : > { %v6939_v22 = vsub.f32 %v3172_v63, %v3193_v46 }
 0x2a1   : > { %5402 = vmatmul.mubr.f32.vlgmr.msra.gmra.mrb[26].mxu1 %v1991_v30  ;;  %v3316_v16 = vand.u32 4294901760, %v6939_v22 }
 0x2a2   : > { %5408 = vmatpush3.msra.mxu1 %v1916_v26  ;;  %5404 = vmatprep.mubr.f32.mxu1 %v2001_v48  ;;  %v6928_v26 = vpack.c.bf16 %v3193_v46, %v3189_v21 }
 0x2a3   : > { %5728 = vmatprep.subr.bf16.mxu1 %v6904_v43  ;;  %v7045_v54 = vpack.c.bf16 %v3316_v16, %v3304_v1 }
 0x2a5   : > { %5405 = vmatmul.mubr.f32.gmra.mrb[28].mxu1 %v2011_v0 }
 0x2a6   : > { %5409 = vmatprep.mubr.f32.mxu1 %v6865_v24  ;;  %v5731_v24 = vpack.c.bf16 %v2660_v41, %v2648_v13  ;;  %v3317_v13 = vsub.f32 %v6939_v22, %v3316_v16  ;;  %v3311_v41 = vsub.f32 %v6931_v27, %v3310_v3 }
 0x2a8   : > { %5732 = vmatprep.subr.bf16.mxu0 %v5731_v24  ;;  %v3318_v24 = vand.u32 4294901760, %v3317_v13 }
 0x2a9   : > { %5410 = vmatmul.mubr.f32.vlgmr.msra.gmra.mrb[26].mxu1 %v1991_v30  ;;  %5734 = vmatpush1.bf16.msra.mxu0 %v5733_v42  ;;  %v6986_v42 = vpack.c.bf16 %v3195_v29, %v3191_v23  ;;  %v3837_v29 = vld [vmem:[%s7466_s5 + $0x10] sm:$0xff] }
 0x2aa   : > { %5412 = vmatprep.mubr.f32.mxu1 %v2001_v48  ;;  %5730 = vmatpush1.bf16.msra.mxu1 %v6907_v53 }
 0x2ab   : > { %5736 = vmatprep.subr.bf16.mxu0 %v5735_v57  ;;  %5752 = vmatprep.subr.bf16.mxu1 %v6928_v26  ;;  %v3312_v57 = vand.u32 4294901760, %v3311_v41 }
 0x2ad   : > { %5413 = vmatmul.mubr.f32.gmra.mrb[28].mxu1 %v2011_v0 }
 0x2ae   : > { %2599 = vmatprep.mubr.f32.mxu1 %v6104_v59 }
 0x37c   : > { %v5411_v11 = vpop.f32.mrb[26].mxu1 }
 0x37d   : > { %v4910_v10 = vmul.f32 -1.442695, %v5411_v11  ;;  %v2468_v12 = vpop.f32.mrb[27].mxu1 }
 0x37e   : > { %v4909_v36 = vmul.f32 -1.442695, %v2468_v12 }
 0x37f   : > { %6009 = vpow2.f32 %v4910_v10 }
 0x380   : > { %6011 = vpow2.f32 %v4909_v36  ;;  %v5414_v30 = vpop.f32.mrb[28].mxu1 }
 0x381   : > { %v4912_v48 = vmul.f32 -1.442695, %v5414_v30  ;;  %v2480_v55 = vpop.f32.mrb[29].mxu1  ;;  %v5755_v30 = vpack.c.bf16 %v3318_v24, %v3306_v6 }
 0x382   : > { %v4911_v31 = vmul.f32 -1.442695, %v2480_v55 }
 0x383   : > { %6013 = vpow2.f32 %v4912_v48 }
 0x384   : > { %6015 = vpow2.f32 %v4911_v31 }
 0x389   : > { %v6010_v0 = vpop.eup %6009 }
 0x38a   : > { %v6012_v19 = vpop.eup %6011  ;;  %v2503_v9 = vadd.f32 1.0, %v6010_v0 }
 0x38b   : > { %v2502_v28 = vadd.f32 1.0, %v6012_v19 }
 0x38c   : > { %6017 = vrcp.f32 %v2503_v9 }
 0x38d   : > { %v6014_v50 = vpop.eup %6013  ;;  %6019 = vrcp.f32 %v2502_v28 }
 0x38e   : > { %v6016_v51 = vpop.eup %6015  ;;  %v2505_v4 = vadd.f32 1.0, %v6014_v50 }
 0x38f   : > { %v2504_v15 = vadd.f32 1.0, %v6016_v51  ;;  %v5759_v51 = vpack.c.bf16 %v6939_v22, %v6937_v40 }
 0x390   : > { %6021 = vrcp.f32 %v2505_v4  ;;  %v5761_v4 = vpack.c.bf16 %v6933_v60, %v6931_v27 }
 0x391   : > { %6023 = vrcp.f32 %v2504_v15  ;;  %v3868_v15 = vand.u32 4294901760, %v3844_v35 }
 0x393   : > { %v7035_v46 = vsub.f32 %v3844_v35, %v3868_v15 }
 0x396   : > { %v6018_v52 = vpop.eup %6017 }
 0x397   : > { %v6020_v25 = vpop.eup %6019  ;;  %3175 = vrot.lane.b32.xlu0 %v6018_v52, %s6106_s25  ;;  %v2523_v20 = vsel %vm2518_vm3, %v6018_v52, 0  ;;  %v7055_v52 = vpack.c.bf16 %v3322_v17, %v3310_v3 }
 0x398   : > { %3173 = vrot.lane.b32.xlu1 %v6020_v25, %s6106_s25  ;;  %v2520_v37 = vsel %vm2518_vm3, %v6020_v25, 0  ;;  %v6943_v32 = vand.u32 4294901760, %v2523_v20  ;;  %v3850_v25 = vpop.permute.xlu0 %3849 }
 0x399   : > { %v6945_v38 = vand.u32 4294901760, %v2520_v37  ;;  %v3877_v1 = vand.u32 4294901760, %v3850_v25 }
 0x39a   : > { %v6022_v39 = vpop.eup %6021  ;;  %v6948_v8 = vsub.f32 %v2523_v20, %v6943_v32 }
 0x39b   : > { %v6024_v45 = vpop.eup %6023  ;;  %v6951_v14 = vsub.f32 %v2520_v37, %v6945_v38  ;;  %2730 = vmatmul.mubr.f32.vlgmr.msra.gmra.mrb[26].mxu0 %v6945_v38  ;;  %3179 = vrot.lane.b32.xlu0 %v6022_v39, %s6106_s25  ;;  %v2529_v2 = vsel %vm2518_vm3, %v6022_v39, 0  ;;  %v3979_v39 = vand.u32 4294901760, %v7035_v46 }
 0x39c   : > { %3177 = vrot.lane.b32.xlu1 %v6024_v45, %s6106_s25  ;;  %2735 = vmatprep.mubr.f32.mxu0 %v6104_v59  ;;  %v2526_v7 = vsel %vm2518_vm3, %v6024_v45, 0  ;;  %v2613_v44 = vand.u32 4294901760, %v6948_v8  ;;  %v6962_v47 = vand.u32 4294901760, %v2529_v2  ;;  %v3838_v45 = vld [vmem:[%s7466_s5 + $0x18] sm:$0xff] }
 0x39d   : > { %v2602_v18 = vand.u32 4294901760, %v6951_v14  ;;  %5738 = vmatpush1.bf16.msra.mxu0 %v5737_v56  ;;  %v6969_v33 = vand.u32 4294901760, %v2526_v7  ;;  %v3323_v56 = vsub.f32 %v6933_v60, %v3322_v17  ;;  %v3865_v3 = vsel %vm1408_vm1, %v3838_v45, 0  ;;  %v7154_v45 = vld [vmem:[%s6494_s29 + $0x10] sm:$0xff] }
 0x39e   : > { %5740 = vmatprep.subr.bf16.mxu0 %v6904_v43  ;;  %v2614_v10 = vsub.f32 %v6948_v8, %v2613_v44  ;;  %v2634_v36 = vsub.f32 %v2529_v2, %v6962_v47  ;;  %v7085_v17 = vsub.f32 %v3850_v25, %v3877_v1  ;;  %v7146_v25 = vld [vmem:[%s6494_s29 + $0x18] sm:$0xff] }
 0x39f   : > { %2737 = vmatmul.mubr.f32.gmra.mrb[28].mxu0 %v6943_v32  ;;  %v2603_v34 = vsub.f32 %v6951_v14, %v2602_v18  ;;  %v2623_v62 = vsub.f32 %v2526_v7, %v6969_v33  ;;  %v3324_v48 = vand.u32 4294901760, %v3323_v56 }
 0x3a0   : > { %2742 = vmatprep.mubr.f32.mxu0 %v6104_v59  ;;  %v2615_v31 = vand.u32 4294901760, %v2614_v10  ;;  %v2635_v19 = vand.u32 4294901760, %v2634_v36 }
 0x3a1   : > { %v2604_v11 = vand.u32 4294901760, %v2603_v34  ;;  %v2624_v12 = vand.u32 4294901760, %v2623_v62  ;;  %v6996_v55 = vpack.c.bf16 %v3324_v48, %v3312_v57 }
 0x3a2   : > { %v2636_v28 = vsub.f32 %v2634_v36, %v2635_v19 }
 0x3a3   : > { %2605 = vmatmul.mubr.f32.vlgmr.msra.gmra.mrb[30].mxu1 %v2604_v11  ;;  %2744 = vmatmul.mubr.f32.gmra.mrb[30].mxu0 %v6969_v33  ;;  %v2625_v0 = vsub.f32 %v2623_v62, %v2624_v12 }
 0x3a4   : > { %2610 = vmatprep.mubr.f32.mxu1 %v6104_v59  ;;  %2749 = vmatprep.mubr.f32.mxu0 %v6104_v59  ;;  %v2637_v50 = vand.u32 4294901760, %v2636_v28 }
 0x3a5   : > { %5754 = vmatpush1.bf16.msra.mxu1 %v6986_v42  ;;  %v2626_v9 = vand.u32 4294901760, %v2625_v0 }
 0x3a6   : > { %5756 = vmatprep.subr.bf16.mxu1 %v5755_v30 }
 0x3a7   : > { %2616 = vmatmul.mubr.f32.gmra.mrb[32].mxu1 %v2615_v31  ;;  %2751 = vmatmul.mubr.f32.gmra.mrb[32].mxu0 %v6962_v47 }
 0x3a8   : > { %2621 = vmatprep.mubr.f32.mxu1 %v6104_v59  ;;  %2829 = vmatprep.mubr.f32.mxu0 %v6104_v59 }
 0x3ab   : > { %2627 = vmatmul.mubr.f32.gmra.mrb[34].mxu1 %v2626_v9  ;;  %2832 = vmatmul.mubr.f32.vlgmr.msra.gmra.mrb[26].mxu0 %v6951_v14 }
 0x3ac   : > { %2632 = vmatprep.mubr.f32.mxu1 %v6104_v59  ;;  %2837 = vmatprep.mubr.f32.mxu0 %v6104_v59 }
 0x3ad   : > { %5742 = vmatpush1.bf16.msra.mxu0 %v6907_v53 }
 0x3ae   : > { %5744 = vmatprep.subr.bf16.mxu0 %v6912_v61  ;;  %v3846_v61 = vpop.permute.xlu1 %3845 }
 0x3af   : > { %2638 = vmatmul.mubr.f32.gmra.mrb[36].mxu1 %v2637_v50  ;;  %2840 = vmatmul.mubr.f32.gmra.mrb[28].mxu0 %v6948_v8  ;;  %v3871_v63 = vand.u32 4294901760, %v3846_v61  ;;  %v3862_v8 = vsel %vm1408_vm1, %v3837_v29, 0  ;;  %v7143_v29 = vld [vmem:[%s6494_s29 + $0x8] sm:$0xff] }
 0x3b0   : > { %2845 = vmatprep.mubr.f32.mxu0 %v6104_v59  ;;  %3257 = vmatprep.mubr.f32.mxu1 %v6104_v59 }
 0x3b1   : > { %v7022_v21 = vpack.c.bf16 %v3871_v63, %v3868_v15 }
 0x3b2   : > { %v3848_v2 = vpop.permute.xlu1 %3847 }
 0x3b3   : > { %2848 = vmatmul.mubr.f32.gmra.mrb[30].mxu0 %v2623_v62  ;;  %v3874_v49 = vand.u32 4294901760, %v3848_v2  ;;  %v7091_v62 = vand.u32 4294901760, %v3865_v3 }
 0x3b4   : > { %2853 = vmatprep.mubr.f32.mxu0 %v6104_v59 }
 0x3b5   : > { %v7083_v41 = vpack.c.bf16 %v3877_v1, %v3874_v49  ;;  %v7099_v57 = vsub.f32 %v3848_v2, %v3874_v49 }
 0x3b7   : > { %2856 = vmatmul.mubr.f32.gmra.mrb[32].mxu0 %v2634_v36  ;;  %v3993_v48 = vand.u32 4294901760, %v7099_v57 }
 0x3b8   : > { %2930 = vmatprep.mubr.f32.mxu0 %v6104_v59 }
 0x3b9   : > { %v3994_v28 = vsub.f32 %v7099_v57, %v3993_v48 }
 0x3bb   : > { %2934 = vmatmul.mubr.f32.vlgmr.msra.gmra.mrb[26].mxu0 %v2602_v18  ;;  %v3980_v18 = vsub.f32 %v7035_v46, %v3979_v39 }
 0x3bc   : > { %2939 = vmatprep.mubr.f32.mxu0 %v6104_v59  ;;  %5746 = vmatpush1.bf16.msra.mxu0 %v6914_v5  ;;  %v3835_v5 = vld [vmem:[%s7466_s5] sm:$0xff] }
 0x3bd   : > { %5748 = vmatprep.subr.bf16.mxu0 %v6904_v43  ;;  %v7028_v43 = vsub.f32 %v3846_v61, %v3871_v63  ;;  %v3856_v58 = vsel %vm1408_vm1, %v3835_v5, 0  ;;  %v3981_v56 = vand.u32 4294901760, %v3980_v18  ;;  %v7170_v18 = vld [vmem:[%s6494_s29 + $0x38] sm:$0xff] }
 0x3be   : > { %v7059_v20 = vand.u32 4294901760, %v3856_v58 }
 0x3bf   : > { %2943 = vmatmul.mubr.f32.gmra.mrb[28].mxu0 %v2613_v44  ;;  %v3986_v23 = vand.u32 4294901760, %v7028_v43  ;;  %v7077_v44 = vand.u32 4294901760, %v3862_v8 }
 0x3c0   : > { %2948 = vmatprep.mubr.f32.mxu0 %v6104_v59  ;;  %v7075_v7 = vsub.f32 %v3856_v58, %v7059_v20  ;;  %v5791_v58 = vpack.c.bf16 %v7028_v43, %v7035_v46 }
 0x3c1   : > { %v3987_v14 = vsub.f32 %v7028_v43, %v3986_v23  ;;  %v7097_v24 = vsub.f32 %v3862_v8, %v7077_v44  ;;  %v7151_v8 = vld [vmem:[%s6494_s29] sm:$0xff] }
 0x3c2   : > { %v3938_v6 = vand.u32 4294901760, %v7075_v7  ;;  %v4481_v43 = vadd.f32 %v7154_v45, %v7151_v8 }
 0x3c3   : > { %2952 = vmatmul.mubr.f32.gmra.mrb[30].mxu0 %v2624_v12  ;;  %v3988_v13 = vand.u32 4294901760, %v3987_v14  ;;  %v7106_v12 = vsub.f32 %v3865_v3, %v7091_v62  ;;  %v3958_v30 = vand.u32 4294901760, %v7097_v24  ;;  %v7163_v14 = vld [vmem:[%s6494_s29 + $0x20] sm:$0xff] }
 0x3c4   : > { %2957 = vmatprep.mubr.f32.mxu0 %v6104_v59  ;;  %v3939_v36 = vsub.f32 %v7075_v7, %v3938_v6  ;;  %v4482_v2 = vadd.f32 %v7163_v14, %v4481_v43 }
 0x3c5   : > { %v5783_v11 = vpack.c.bf16 %v3988_v13, %v3981_v56  ;;  %v3968_v0 = vand.u32 4294901760, %v7106_v12  ;;  %v3959_v9 = vsub.f32 %v7097_v24, %v3958_v30  ;;  %v7174_v13 = vld [vmem:[%s6494_s29 + $0x30] sm:$0xff] }
 0x3c7   : > { %2961 = vmatmul.mubr.f32.gmra.mrb[32].mxu0 %v2635_v19  ;;  %v3940_v19 = vand.u32 4294901760, %v3939_v36  ;;  %v3969_v35 = vsub.f32 %v7106_v12, %v3968_v0  ;;  %v3960_v63 = vand.u32 4294901760, %v3959_v9 }
 0x3c8   : > { %3043 = vmatprep.mubr.f32.mxu0 %v6104_v59 }
 0x3c9   : > { %v3970_v5 = vand.u32 4294901760, %v3969_v35 }
 0x3cb   : > { %3045 = vmatmul.mubr.f32.vlgmr.msra.gmra.mrb[26].mxu0 %v6945_v38 }
 0x3cc   : > { %5750 = vmatpush1.bf16.msra.mxu0 %v6907_v53  ;;  %3050 = vmatprep.mubr.f32.mxu0 %v6104_v59  ;;  %v3836_v53 = vld [vmem:[%s7466_s5 + $0x8] sm:$0xff] }
 0x3cd   : > { %5776 = vmatprep.subr.bf16.mxu0 %v7022_v21  ;;  %v3859_v37 = vsel %vm1408_vm1, %v3836_v53, 0  ;;  %v5807_v53 = vpack.c.bf16 %v3986_v23, %v3979_v39  ;;  %v7159_v23 = vld [vmem:[%s6494_s29 + $0x28] sm:$0xff]  ;;  %s6107_s29 = smov 17  }
 0x3ce   : > { %v7071_v16 = vand.u32 4294901760, %v3859_v37 }
 0x3cf   : > { %3052 = vmatmul.mubr.f32.gmra.mrb[28].mxu0 %v6943_v32 }
 0x3d0   : > { %3057 = vmatprep.mubr.f32.mxu0 %v6104_v59  ;;  %v7089_v34 = vsub.f32 %v3859_v37, %v7071_v16  ;;  %v4490_v37 = vadd.f32 %v7146_v25, %v7143_v29 }
 0x3d2   : > { %v3948_v10 = vand.u32 4294901760, %v7089_v34  ;;  %v4491_v39 = vadd.f32 %v7159_v23, %v4490_v37 }
 0x3d3   : > { %3059 = vmatmul.mubr.f32.gmra.mrb[30].mxu0 %v6969_v33 }
 0x3d4   : > { %3064 = vmatprep.mubr.f32.mxu0 %v6104_v59  ;;  %v4492_v49 = vadd.f32 %v7170_v18, %v4491_v39 }
 0x3d7   : > { %3066 = vmatmul.mubr.f32.gmra.mrb[32].mxu0 %v6962_v47 }
 0x3d8   : > { %3140 = vmatprep.mubr.f32.mxu0 %v6104_v59 }
 0x3db   : > { %3142 = vmatmul.mubr.f32.vlgmr.msra.gmra.mrb[26].mxu0 %v6945_v38  ;;  %v4000_v38 = vand.u32 4294901760, %v7085_v17 }
 0x3dc   : > { %5778 = vmatpush3.bf16.msra.mxu0 %v7022_v21  ;;  %3147 = vmatprep.mubr.f32.mxu0 %v6104_v59 }
 0x3dd   : > { %5780 = vmatprep.subr.bf16.mxu0 %v7083_v41  ;;  %v4001_v31 = vsub.f32 %v7085_v17, %v4000_v38  ;;  %v5811_v46 = vpack.c.bf16 %v4000_v38, %v3993_v48 }
 0x3df   : > { %3149 = vmatmul.mubr.f32.gmra.mrb[28].mxu0 %v6943_v32  ;;  %v3949_v32 = vsub.f32 %v7089_v34, %v3948_v10  ;;  %v4002_v61 = vand.u32 4294901760, %v4001_v31 }
 0x3e0   : > { %5782 = vmatpush3.bf16.msra.mxu0 %v7083_v41  ;;  %3154 = vmatprep.mubr.f32.mxu0 %v6104_v59 }
 0x3e1   : > { %5784 = vmatprep.subr.bf16.mxu0 %v5783_v11  ;;  %v3950_v50 = vand.u32 4294901760, %v3949_v32 }
 0x3e3   : > { %3156 = vmatmul.mubr.f32.gmra.mrb[30].mxu0 %v6969_v33  ;;  %v3995_v33 = vand.u32 4294901760, %v3994_v28 }
 0x3e4   : > { %3161 = vmatprep.mubr.f32.mxu0 %v6104_v59 }
 0x3e5   : > { %v5787_v15 = vpack.c.bf16 %v4002_v61, %v3995_v33 }
 0x3e7   : > { %3163 = vmatmul.mubr.f32.gmra.mrb[32].mxu0 %v6962_v47  ;;  %v5795_v47 = vpack.c.bf16 %v7085_v17, %v7099_v57  ;;  %v4483_v17 = vadd.f32 %v7174_v13, %v4482_v2 }
 0x3e8   : > { %5423 = vmatprep.mubr.f32.mxu0 %v3940_v19 }
 0x3e9   : > { %v4484_v36 = vrot.slane %v4483_v17, 4 }
 0x3eb   : > { %5424 = vmatmul.mubr.f32.vlgmr.msra.gmra.mrb[34].mxu0 %v3950_v50  ;;  %v4485_v28 = vadd.f32 %v4484_v36, %v4483_v17 }
 0x3ec   : > { %5786 = vmatpush3.bf16.msra.mxu0 %v5783_v11  ;;  %5426 = vmatprep.mubr.f32.mxu0 %v3960_v63 }
 0x3ed   : > { %5788 = vmatprep.subr.bf16.mxu0 %v5787_v15  ;;  %v4486_v63 = vrot.slane %v4485_v28, 2 }
 0x3ef   : > { %5427 = vmatmul.mubr.f32.gmra.mrb[36].mxu0 %v3970_v5 }
 0x3f0   : > { %5790 = vmatpush3.bf16.msra.mxu0 %v5787_v15  ;;  %5437 = vmatprep.mubr.f32.mxu0 %v7059_v20 }
 0x3f1   : > { %5792 = vmatprep.subr.bf16.mxu0 %v5791_v58 }
 0x3f3   : > { %5438 = vmatmul.mubr.f32.vlgmr.msra.gmra.mrb[34].mxu0 %v7071_v16 }
 0x3f4   : > { %5794 = vmatpush3.bf16.msra.mxu0 %v5791_v58  ;;  %5440 = vmatprep.mubr.f32.mxu0 %v7077_v44 }
 0x3f5   : > { %5796 = vmatprep.subr.bf16.mxu0 %v5795_v47 }
 0x3f7   : > { %5441 = vmatmul.mubr.f32.gmra.mrb[36].mxu0 %v7091_v62 }
 0x3f8   : > { %5798 = vmatpush3.bf16.msra.mxu0 %v5795_v47  ;;  %5451 = vmatprep.mubr.f32.mxu0 %v7075_v7 }
 0x3f9   : > { %5800 = vmatprep.subr.bf16.mxu0 %v7022_v21 }
 0x3fb   : > { %5452 = vmatmul.mubr.f32.vlgmr.msra.gmra.mrb[34].mxu0 %v7089_v34 }
 0x3fc   : > { %5802 = vmatpush3.bf16.msra.mxu0 %v7022_v21  ;;  %5454 = vmatprep.mubr.f32.mxu0 %v7097_v24 }
 0x3fd   : > { %5804 = vmatprep.subr.bf16.mxu0 %v7083_v41 }
 0x3ff   : > { %5455 = vmatmul.mubr.f32.gmra.mrb[36].mxu0 %v7106_v12  ;;  %v4493_v12 = vrot.slane %v4492_v49, 4 }
 0x400   : > { %5806 = vmatpush3.bf16.msra.mxu0 %v7083_v41  ;;  %5465 = vmatprep.mubr.f32.mxu0 %v3938_v6 }
 0x401   : > { %5808 = vmatprep.subr.bf16.mxu0 %v5807_v53  ;;  %v4494_v9 = vadd.f32 %v4493_v12, %v4492_v49 }
 0x403   : > { %5466 = vmatmul.mubr.f32.vlgmr.msra.gmra.mrb[34].mxu0 %v3948_v10 }
 0x404   : > { %5810 = vmatpush3.bf16.msra.mxu0 %v5807_v53  ;;  %5468 = vmatprep.mubr.f32.mxu0 %v3958_v30 }
 0x405   : > { %5812 = vmatprep.subr.bf16.mxu0 %v5811_v46 }
 0x407   : > { %5469 = vmatmul.mubr.f32.gmra.mrb[36].mxu0 %v3968_v0 }
 0x408   : > { %5814 = vmatpush3.bf16.msra.mxu0 %v5811_v46  ;;  %5479 = vmatprep.mubr.f32.mxu0 %v7059_v20 }
 0x409   : > { %5816 = vmatprep.subr.bf16.mxu0 %v7022_v21  ;;  %v3176_v1 = vpop.permute.xlu0 %3175 }
 0x40a   : > { %v3183_v7 = vsel %vm2518_vm3, %v3176_v1, 0  ;;  %v3174_v3 = vpop.permute.xlu1 %3173 }
 0x40b   : > { %v7177_v34 = vand.u32 4294901760, %v3183_v7  ;;  %v3181_v6 = vsel %vm2518_vm3, %v3174_v3, 0  ;;  %5480 = vmatmul.mubr.f32.vlgmr.msra.gmra.mrb[34].mxu0 %v7071_v16 }
 0x40c   : > { %v7181_v24 = vand.u32 4294901760, %v3181_v6  ;;  %5818 = vmatpush3.bf16.msra.mxu0 %v7022_v21  ;;  %5482 = vmatprep.mubr.f32.mxu0 %v7077_v44 }
 0x40d   : > { %v7186_v57 = vsub.f32 %v3183_v7, %v7177_v34  ;;  %5820 = vmatprep.subr.bf16.mxu0 %v7083_v41  ;;  %v3180_v56 = vpop.permute.xlu0 %3179 }
 0x40e   : > { %v7190_v38 = vsub.f32 %v3181_v6, %v7181_v24  ;;  %v3187_v11 = vsel %vm2518_vm3, %v3180_v56, 0  ;;  %v3178_v10 = vpop.permute.xlu1 %3177 }
 0x40f   : > { %v3185_v30 = vsel %vm2518_vm3, %v3178_v10, 0  ;;  %5483 = vmatmul.mubr.f32.gmra.mrb[36].mxu0 %v7091_v62  ;;  %v3271_v21 = vand.u32 4294901760, %v7186_v57  ;;  %v7197_v31 = vand.u32 4294901760, %v3187_v11 }
 0x410   : > { %v3260_v48 = vand.u32 4294901760, %v7190_v38  ;;  %v7199_v32 = vand.u32 4294901760, %v3185_v30  ;;  %5822 = vmatpush3.bf16.msra.mxu0 %v7083_v41  ;;  %5493 = vmatprep.mubr.f32.mxu0 %v7059_v20  ;;  %v4495_v41 = vrot.slane %v4494_v9, 2 }
 0x411   : > { %v7211_v61 = vsub.f32 %v3187_v11, %v7197_v31  ;;  %v3272_v20 = vsub.f32 %v7186_v57, %v3271_v21 }
 0x412   : > { %v3261_v0 = vsub.f32 %v7190_v38, %v3260_v48  ;;  %v7207_v19 = vsub.f32 %v3185_v30, %v7199_v32 }
 0x413   : > { %5494 = vmatmul.mubr.f32.vlgmr.msra.gmra.mrb[34].mxu0 %v7071_v16  ;;  %v3293_v16 = vand.u32 4294901760, %v7211_v61  ;;  %v3273_v33 = vand.u32 4294901760, %v3272_v20 }
 0x414   : > { %v3262_v50 = vand.u32 4294901760, %v3261_v0  ;;  %v3282_v35 = vand.u32 4294901760, %v7207_v19  ;;  %5496 = vmatprep.mubr.f32.mxu0 %v7077_v44  ;;  %v4496_v44 = vadd.f32 %v4495_v41, %v4494_v9  ;;  %v6114_v9 = vmov 1966171168  }
 0x415   : > { %v3294_v58 = vsub.f32 %v7211_v61, %v3293_v16 }
 0x416   : > { %3263 = vmatmul.mubr.f32.vlgmr.msra.gmra.mrb[38].mxu1 %v3262_v50  ;;  %v3283_v15 = vsub.f32 %v7207_v19, %v3282_v35  ;;  %v4497_v47 = vrot.slane %v4496_v44, 1 }
 0x417   : > { %5497 = vmatmul.mubr.f32.gmra.mrb[36].mxu0 %v7091_v62  ;;  %3268 = vmatprep.mubr.f32.mxu1 %v6104_v59  ;;  %v4487_v62 = vadd.f32 %v4486_v63, %v4485_v28  ;;  %v4516_v28 = vunpack.c.l.s4 %v6114_v9 }
 0x418   : > { %5758 = vmatpush1.bf16.msra.mxu1 %v6996_v55  ;;  %v3284_v5 = vand.u32 4294901760, %v3283_v15  ;;  %v3295_v55 = vand.u32 4294901760, %v3294_v58  ;;  %v4498_v37 = vadd.f32 %v4497_v47, %v4496_v44 }
 0x419   : > { %5760 = vmatprep.subr.bf16.mxu1 %v5759_v51  ;;  %v4488_v53 = vrot.slane %v4487_v62, 1 }
 0x41a   : > { %3274 = vmatmul.mubr.f32.gmra.mrb[40].mxu1 %v3273_v33  ;;  %v7235_v22 = vmul.f32 0.03125, %v4498_v37 }
 0x41b   : > { %3279 = vmatprep.mubr.f32.mxu1 %v6104_v59  ;;  %v4489_v40 = vadd.f32 %v4488_v53, %v4487_v62 }
 0x41c   : > { %4504 = vrot.lane.b32.xlu0 %v7235_v22, %s6107_s29 }
 0x41d   : > { %v7241_v51 = vmul.f32 0.03125, %v4489_v40 }
 0x41e   : > { %3285 = vmatmul.mubr.f32.gmra.mrb[42].mxu1 %v3284_v5 }
 0x41f   : > { %3290 = vmatprep.mubr.f32.mxu1 %v6104_v59  ;;  %4502 = vrot.lane.b32.xlu1 %v7241_v51, %s6107_s29  ;;  %s6115_s29 = smov [#allocation2]  }
 0x420   : > { %4534 = vrot.lane.b32.xlu0 %v7235_v22, %s6108_s23 }
 0x422   : > { %3296 = vmatmul.mubr.f32.gmra.mrb[44].mxu1 %v3295_v55 }
 0x423   : > { %3386 = vmatprep.mubr.f32.mxu1 %v6104_v59  ;;  %4532 = vrot.lane.b32.xlu1 %v7241_v51, %s6108_s23 }
 0x424   : > { %4563 = vrot.lane.b32.xlu0 %v7235_v22, %s6109_s24 }
 0x426   : > { %3388 = vmatmul.mubr.f32.vlgmr.msra.gmra.mrb[38].mxu1 %v7181_v24 }
 0x427   : > { %3393 = vmatprep.mubr.f32.mxu1 %v6104_v59  ;;  %5762 = vmatpush1.bf16.msra.mxu1 %v5761_v4 }
 0x428   : > { %5764 = vmatprep.subr.bf16.mxu1 %v6928_v26  ;;  %4561 = vrot.lane.b32.xlu1 %v7241_v51, %s6109_s24  ;;  %s6041_s24 = sshll.u32 %s6115_s29, 4  ;;  %s6042_s24 = int_to_ptr.vmem [resolvable:$false] %s6041_s24 }
 0x429   : > { %4592 = vrot.lane.b32.xlu0 %v7235_v22, %s6110_s26 }
 0x42a   : > { %3395 = vmatmul.mubr.f32.gmra.mrb[40].mxu1 %v7177_v34 }
 0x42b   : > { %3400 = vmatprep.mubr.f32.mxu1 %v6104_v59 }
 0x42c   : > { %4590 = vrot.lane.b32.xlu1 %v7241_v51, %s6110_s26  ;;  %s323_s26 = sand.u32 1, %s6091_s10  }
 0x42d   : > { %4643 = vrot.lane.b32.xlu0 %v7235_v22, %s6111_s27  ;;  %s7419_s21 = scalar_lea.sflag [#allocation3], %s323_s26 }
 0x42e   : > { %3402 = vmatmul.mubr.f32.gmra.mrb[42].mxu1 %v7199_v32 }
 0x42f   : > { %3407 = vmatprep.mubr.f32.mxu1 %v6104_v59 }
 0x430   : > { %4641 = vrot.lane.b32.xlu1 %v7241_v51, %s6111_s27  ;;  %s4906_s27 = sshll.u32 %s323_s26, 6 }
 0x431   : > { %4672 = vrot.lane.b32.xlu0 %v7235_v22, %s6112_s28 }
 0x432   : > { %3409 = vmatmul.mubr.f32.gmra.mrb[44].mxu1 %v7197_v31 }
 0x433   : > { %3487 = vmatprep.mubr.f32.mxu1 %v6104_v59 }
 0x434   : > { %4670 = vrot.lane.b32.xlu1 %v7241_v51, %s6112_s28  ;;  %s4928_s28 = sshll.u32 %s6188_s13, 10 }
 0x435   : > { %4701 = vrot.lane.b32.xlu0 %v7235_v22, %s6106_s25  ;;  %s7411_s13 = scalar_lea.hbm %s7470_s9, %s4928_s28 }
 0x436   : > { %3490 = vmatmul.mubr.f32.vlgmr.msra.gmra.mrb[38].mxu1 %v7190_v38 }
 0x437   : > { %3495 = vmatprep.mubr.f32.mxu1 %v6104_v59  ;;  %5766 = vmatpush1.bf16.msra.mxu1 %v6986_v42 }
 0x438   : > { %5768 = vmatprep.subr.bf16.mxu1 %v7045_v54  ;;  %4699 = vrot.lane.b32.xlu1 %v7241_v51, %s6106_s25 }
 0x439   : > { %4730 = vrot.lane.b32.xlu0 %v7235_v22, %s6113_s14 }
 0x43a   : > { %3498 = vmatmul.mubr.f32.gmra.mrb[40].mxu1 %v7186_v57 }
 0x43b   : > { %3503 = vmatprep.mubr.f32.mxu1 %v6104_v59 }
 0x43c   : > { %4728 = vrot.lane.b32.xlu1 %v7241_v51, %s6113_s14  ;;  %s325_s14 = scalar_lea.vmem [#allocation2], %s4906_s27  ;;  %s6043_s27 = scalar_lea.vmem %s6042_s24, 2048 }
 0x43d   : > { %s4840_s25 = sshll.u32 %s325_s14, 4  ;;  %s7415_s25 = int_to_ptr.vmem [resolvable:$true] %s4840_s25 }
 0x43e   : > { %3506 = vmatmul.mubr.f32.gmra.mrb[42].mxu1 %v7207_v19  ;;  %s6037_s22 = scalar_lea.vmem %s7415_s25, 1024  ;;  %p6044_p0 = scmp.lt.s32.totalorder %s7415_s25, %s6042_s24 }
 0x43f   : > { %3511 = vmatprep.mubr.f32.mxu1 %v6104_v59  ;;  %p6038_p11 = scmp.ne.s32.totalorder %s7415_s25, %s6037_s22  ;;  %p6045_p1 = scmp.lt.s32.totalorder %s6043_s27, %s6037_s22 }
 0x441   : > { %p6039_p12 = pnand %p6038_p11, %p6205_p5  ;;  %p6046_p2 = por %p6045_p1, %p6044_p0 }
 0x442   : > { %3514 = vmatmul.mubr.f32.gmra.mrb[44].mxu1 %v7211_v61 }
 0x443   : > { %3588 = vmatprep.mubr.f32.mxu1 %v6104_v59  ;;  %p6040_p13 = pneg %p6039_p12 }
 0x445   : > { %p6047_p3 = pnand %p6046_p2, %p6040_p13 }
 0x446   : > { %3592 = vmatmul.mubr.f32.vlgmr.msra.gmra.mrb[38].mxu1 %v3260_v48 }
 0x447   : > { %3597 = vmatprep.mubr.f32.mxu1 %v6104_v59  ;;  %5770 = vmatpush1.bf16.msra.mxu1 %v7055_v52 }
 0x448   : > { %5772 = vmatprep.subr.bf16.mxu1 %v6928_v26 }
 0x44a   : > { %3601 = vmatmul.mubr.f32.gmra.mrb[40].mxu1 %v3271_v21 }
 0x44b   : > { %3606 = vmatprep.mubr.f32.mxu1 %v6104_v59 }
 0x44e   : > { %3610 = vmatmul.mubr.f32.gmra.mrb[42].mxu1 %v3282_v35  ;;  %v4517_v35 = vunpack.c.0.s8 %v4516_v28 }
 0x44f   : > { %3615 = vmatprep.mubr.f32.mxu1 %v6104_v59 }
 0x452   : > { %3619 = vmatmul.mubr.f32.gmra.mrb[44].mxu1 %v3293_v16 }
 0x453   : > { %3701 = vmatprep.mubr.f32.mxu1 %v6104_v59 }
 0x456   : > { %3703 = vmatmul.mubr.f32.vlgmr.msra.gmra.mrb[38].mxu1 %v7181_v24 }
 0x457   : > { %3708 = vmatprep.mubr.f32.mxu1 %v6104_v59  ;;  %5774 = vmatpush1.bf16.msra.mxu1 %v6986_v42 }
 0x45a   : > { %3710 = vmatmul.mubr.f32.gmra.mrb[40].mxu1 %v7177_v34 }
 0x45b   : > { %3715 = vmatprep.mubr.f32.mxu1 %v6104_v59 }
 0x45e   : > { %3717 = vmatmul.mubr.f32.gmra.mrb[42].mxu1 %v7199_v32 }
 0x45f   : > { %3722 = vmatprep.mubr.f32.mxu1 %v6104_v59 }
 0x462   : > { %3724 = vmatmul.mubr.f32.gmra.mrb[44].mxu1 %v7197_v31 }
 0x463   : > { %3798 = vmatprep.mubr.f32.mxu1 %v6104_v59 }
 0x466   : > { %3800 = vmatmul.mubr.f32.vlgmr.msra.gmra.mrb[38].mxu1 %v7181_v24 }
 0x467   : > { %3805 = vmatprep.mubr.f32.mxu1 %v6104_v59 }
 0x46a   : > { %3807 = vmatmul.mubr.f32.gmra.mrb[40].mxu1 %v7177_v34 }
 0x46b   : > { %3812 = vmatprep.mubr.f32.mxu1 %v6104_v59 }
 0x46e   : > { %3814 = vmatmul.mubr.f32.gmra.mrb[42].mxu1 %v7199_v32 }
 0x46f   : > { %3819 = vmatprep.mubr.f32.mxu1 %v6104_v59 }
 0x472   : > { %3821 = vmatmul.mubr.f32.gmra.mrb[44].mxu1 %v7197_v31  ;;  %v4506_v31 = vlaneseq }
 0x474   : > { %v7326_v19 = vand.u32 127, %v4506_v31  ;;  %v7330_v20 = vshrl.u32 %v4506_v31, 7  ;;  %v4915_v31 = vld [vmem:[%s7469_s8 + $0x3] ss:$8 sm:$0x3] }
 0x476   : > { %v2606_v26 = vpop.f32.mrb[30].mxu1  ;;  %vm4508_vm4 = vcmp.lt.s32.totalorder %v7326_v19, 17  ;;  %vm4536_vm5 = vcmp.lt.s32.totalorder %v7326_v19, 16  ;;  %vm4565_vm6 = vcmp.lt.s32.totalorder %v7326_v19, 15  ;;  %v7334_v62 = vsub.s32 %v4517_v35, %v7330_v20 }
 0x477   : > { %v2608_v27 = vpop.f32.mrb[31].mxu1  ;;  %vm4594_vm7 = vcmp.lt.s32.totalorder %v7326_v19, 1  ;;  %vm4645_vm8 = vcmp.lt.s32.totalorder %v7326_v19, 127  ;;  %vm4674_vm9 = vcmp.lt.s32.totalorder %v7326_v19, 113  ;;  %vm4703_vm10 = vcmp.lt.s32.totalorder %v7326_v19, 112 }
 0x478   : > { %vm4732_vm11 = vcmp.lt.s32.totalorder %v7326_v19, 111 }
 0x47a   : > { %v2617_v60 = vpop.f32.mrb[32].mxu1 }
 0x47b   : > { %v2619_v42 = vpop.f32.mrb[33].mxu1 }
 0x47e   : > { %v2628_v4 = vpop.f32.mrb[34].mxu1 }
 0x47f   : > { %v2630_v54 = vpop.f32.mrb[35].mxu1 }
 0x482   : > { %v2639_v52 = vpop.f32.mrb[36].mxu1 }
 0x483   : > { %v2641_v43 = vpop.f32.mrb[37].mxu1 }
 0x48e   : > { %v4505_v21 = vpop.permute.xlu0 %4504 }
 0x491   : > { %v4503_v48 = vpop.permute.xlu1 %4502 }
 0x492   : > { %v4535_v32 = vpop.permute.xlu0 %4534  ;;  %v4509_v41 = vsel %vm4508_vm4, %v4503_v48, %v4505_v21  ;;  %v4510_v63 = vsel %vm4508_vm4, %v4505_v21, %v4503_v48 }
 0x493   : > { %v4514_v5 = vcombine.low %v4510_v63, %v4509_v41  ;;  %v4916_v63 = vld [vmem:[%s7469_s8 + $0x4] ss:$8 sm:$0x3] }
 0x495   : > { %v4533_v0 = vpop.permute.xlu1 %4532  ;;  %v4521_v55 = vrot.slane %v4514_v5, %v7334_v62 }
 0x496   : > { %v4564_v50 = vpop.permute.xlu0 %4563  ;;  %v4537_v16 = vsel %vm4536_vm5, %v4533_v0, %v4535_v32  ;;  %v4538_v33 = vsel %vm4536_vm5, %v4535_v32, %v4533_v0 }
 0x497   : > { %v4543_v58 = vcombine.low %v4538_v33, %v4537_v16 }
 0x499   : > { %v4550_v37 = vrot.slane %v4543_v58, %v7334_v62 }
 0x49a   : > { %v4562_v61 = vpop.permute.xlu1 %4561 }
 0x49b   : > { %v4593_v15 = vpop.permute.xlu0 %4592  ;;  %v4566_v47 = vsel %vm4565_vm6, %v4562_v61, %v4564_v50  ;;  %v4567_v53 = vsel %vm4565_vm6, %v4564_v50, %v4562_v61 }
 0x49c   : > { %v4572_v40 = vcombine.low %v4567_v53, %v4566_v47 }
 0x49e   : > { %v4591_v44 = vpop.permute.xlu1 %4590 }
 0x4ae   : > { %v3143_v46 = vpop.f32.mrb[26].mxu0 }
 0x4af   : > { %v7310_v39 = vadd.f32 %v3143_v46, %v2606_v26  ;;  %v3145_v2 = vpop.f32.mrb[27].mxu0  ;;  %v4595_v26 = vsel %vm4594_vm7, %v4591_v44, %v4593_v15  ;;  %v4511_v46 = vld [vmem:[%s7469_s8] ss:$8 sm:$0x3] }
 0x4b0   : > { %v7312_v1 = vadd.f32 %v3145_v2, %v2608_v27  ;;  %v4596_v27 = vsel %vm4594_vm7, %v4593_v15, %v4591_v44  ;;  %v4913_v2 = vld [vmem:[%s7469_s8 + $0x1] ss:$8 sm:$0x3] }
 0x4b2   : > { %v3150_v7 = vpop.f32.mrb[28].mxu0 }
 0x4b3   : > { %v7314_v3 = vadd.f32 %v3150_v7, %v2617_v60  ;;  %v3152_v59 = vpop.f32.mrb[29].mxu0  ;;  %v4644_v60 = vpop.permute.xlu0 %4643  ;;  %v4623_v7 = vcombine.low %v7241_v51, %v7235_v22 }
 0x4b4   : > { %v7316_v49 = vadd.f32 %v3152_v59, %v2619_v42  ;;  %v4642_v42 = vpop.permute.xlu1 %4641 }
 0x4b5   : > { %v4630_v48 = vrot.slane %v4623_v7, %v7334_v62 }
 0x4b6   : > { %v3157_v17 = vpop.f32.mrb[30].mxu0 }
 0x4b7   : > { %v7318_v34 = vadd.f32 %v3157_v17, %v2628_v4  ;;  %v3159_v6 = vpop.f32.mrb[31].mxu0  ;;  %v4528_v4 = vrot.slane %v4521_v55, %v7334_v62  ;;  %v4673_v59 = vpop.permute.xlu0 %4672  ;;  %v4637_v41 = vrot.slane %v4630_v48, %v7334_v62 }
 0x4b8   : > { %v7320_v24 = vadd.f32 %v3159_v6, %v2630_v54  ;;  %v4557_v54 = vrot.slane %v4550_v37, %v7334_v62  ;;  %v4671_v17 = vpop.permute.xlu1 %4670 }
 0x4b9   : > { %v4530_v6 = vmul.f32 %v4528_v4, %v4511_v46  ;;  %v4675_v28 = vsel %vm4674_vm9, %v4671_v17, %v4673_v59  ;;  %v4676_v50 = vsel %vm4674_vm9, %v4673_v59, %v4671_v17  ;;  %v4639_v53 = vmul.f32 %v4916_v63, %v4637_v41  ;;  %v4919_v17 = vld [vmem:[%s7469_s8 + $0x7] ss:$8 sm:$0x3] }
 0x4ba   : > { %v3164_v57 = vpop.f32.mrb[32].mxu0  ;;  %v4681_v33 = vcombine.low %v4675_v28, %v4676_v50 }
 0x4bb   : > { %v7322_v56 = vadd.f32 %v3164_v57, %v2639_v52  ;;  %v3166_v38 = vpop.f32.mrb[33].mxu0  ;;  %v4579_v52 = vrot.slane %v4572_v40, %v7334_v62  ;;  %v4559_v57 = vmul.f32 %v4913_v2, %v4557_v54  ;;  %v4702_v0 = vpop.permute.xlu0 %4701 }
 0x4bc   : > { %v7324_v11 = vadd.f32 %v3166_v38, %v2641_v43  ;;  %v4601_v43 = vcombine.low %v4596_v27, %v4595_v26  ;;  %v4700_v9 = vpop.permute.xlu1 %4699  ;;  %v4688_v37 = vrot.slane %v4681_v33, %v7334_v62  ;;  %v4917_v26 = vld [vmem:[%s7469_s8 + $0x5] ss:$8 sm:$0x3]  ;;  %v4798_v33 = vsub.s32 1, %v7330_v20 }
 0x4bd   : > { %v4586_v38 = vrot.slane %v4579_v52, %v7334_v62  ;;  %v4560_v21 = vadd.f32 %v4559_v57, %v4530_v6  ;;  %v4704_v15 = vsel %vm4703_vm10, %v4700_v9, %v4702_v0  ;;  %v4705_v44 = vsel %vm4703_vm10, %v4702_v0, %v4700_v9 }
 0x4be   : > { %v4710_v40 = vcombine.low %v4704_v15, %v4705_v44  ;;  %v4695_v54 = vrot.slane %v4688_v37, %v7334_v62 }
 0x4bf   : > { %v4731_v5 = vpop.permute.xlu0 %4730 }
 0x4c0   : > { %v4729_v58 = vpop.permute.xlu1 %4728  ;;  %v4717_v19 = vrot.slane %v4710_v40, %v7334_v62 }
 0x4c1   : > { %v4733_v27 = vsel %vm4732_vm11, %v4729_v58, %v4731_v5 }
 0x4c2   : > { %v4724_v7 = vrot.slane %v4717_v19, %v7334_v62 }
 0x4e6   : > { %v5495_v10 = vpop.f32.mrb[34].mxu0 }
 0x4e7   : > { %4770 = vperm.xlu0 %6007, %v5495_v10   ;;  %v4459_v12 = vpop.f32.mrb[35].mxu0  ;;  %v4608_v10 = vrot.slane %v4601_v43, %v7334_v62  ;;  %v4918_v43 = vld [vmem:[%s7469_s8 + $0x6] ss:$8 sm:$0x3] }
 0x4e8   : > { %4765 = vperm.xlu1 %6008, %v4459_v12   ;;  %v4914_v12 = vld [vmem:[%s7469_s8 + $0x2] ss:$8 sm:$0x3]  ;;  %v4697_v2 = vmul.f32 %v4918_v43, %v4695_v54 }
 0x4e9   : > { %v4588_v22 = vmul.f32 %v4914_v12, %v4586_v38  ;;  %v4615_v51 = vrot.slane %v4608_v10, %v7334_v62  ;;  %v4726_v38 = vmul.f32 %v4919_v17, %v4724_v7 }
 0x4ea   : > { %v5498_v36 = vpop.f32.mrb[36].mxu0 }
 0x4eb   : > { %4780 = vperm.xlu0 %6007, %v5498_v36   ;;  %v4471_v30 = vpop.f32.mrb[37].mxu0  ;;  %v4646_v36 = vsel %vm4645_vm8, %v4642_v42, %v4644_v60  ;;  %v4589_v61 = vadd.f32 %v4588_v22, %v4560_v21  ;;  %v4617_v35 = vmul.f32 %v4915_v31, %v4615_v51 }
 0x4ec   : > { %4775 = vperm.xlu1 %6008, %v4471_v30   ;;  %v4647_v30 = vsel %vm4645_vm8, %v4644_v60, %v4642_v42  ;;  %v4734_v60 = vsel %vm4732_vm11, %v4731_v5, %v4729_v58 }
 0x4ed   : > { %v4652_v32 = vcombine.low %v4646_v36, %v4647_v30  ;;  %v4618_v47 = vadd.f32 %v4617_v35, %v4589_v61  ;;  %v4739_v52 = vcombine.low %v4733_v27, %v4734_v60  ;;  %v4920_v30 = vld [vmem:[%s7469_s8 + $0x10] ss:$8 sm:$0x3] }
 0x4ef   : > { %v4659_v16 = vrot.slane %v4652_v32, %v7334_v62  ;;  %v4640_v42 = vadd.f32 %v4639_v53, %v4618_v47  ;;  %v4746_v59 = vrot.slane %v4739_v52, %v7334_v62 }
 0x4f1   : > { %v4666_v55 = vrot.slane %v4659_v16, %v7334_v62  ;;  %v4753_v10 = vrot.slane %v4746_v59, %v7334_v62 }
 0x4f3   : > { %v4668_v4 = vmul.f32 %v4917_v26, %v4666_v55  ;;  %v4755_v48 = vmul.f32 %v4920_v30, %v4753_v10 }
 0x4f5   : > { %v4669_v46 = vadd.f32 %v4668_v4, %v4640_v42 }
 0x4f7   : > { %v4698_v6 = vadd.f32 %v4697_v2, %v4669_v46 }
 0x4f9   : > { %v4727_v22 = vadd.f32 %v4726_v38, %v4698_v6 }
 0x4fb   : > { %v4756_v9 = vadd.f32 %v4755_v48, %v4727_v22 }
 0x4fd   : > { %v4921_v61 = vmul.f32 -1.442695, %v4756_v9 }
 0x4ff   : > { %6025 = vpow2.f32 %v4921_v61 }
 0x539   : > { %v3801_v57 = vpop.f32.mrb[38].mxu1 }
 0x53a   : > { %v3827_v12 = vmul.f32 %v7310_v39, %v3801_v57  ;;  %v3803_v36 = vpop.f32.mrb[39].mxu1 }
 0x53b   : > { %v3828_v21 = vmul.f32 %v7312_v1, %v3803_v36 }
 0x53d   : > { %v3808_v51 = vpop.f32.mrb[40].mxu1 }
 0x53e   : > { %v3829_v31 = vmul.f32 %v7314_v3, %v3808_v51  ;;  %v3810_v32 = vpop.f32.mrb[41].mxu1  ;;  %v6026_v3 = vpop.eup %6025 }
 0x53f   : > { %v3830_v0 = vmul.f32 %v7316_v49, %v3810_v32  ;;  %v4760_v16 = vadd.f32 1.0, %v6026_v3  ;;  %v4794_v49 = vsub.s32 0, %v7330_v20 }
 0x541   : > { %v3815_v28 = vpop.f32.mrb[42].mxu1  ;;  %6027 = vrcp.f32 %v4760_v16 }
 0x542   : > { %v3831_v39 = vmul.f32 %v7318_v34, %v3815_v28  ;;  %v3817_v62 = vpop.f32.mrb[43].mxu1 }
 0x543   : > { %v3832_v50 = vmul.f32 %v7320_v24, %v3817_v62 }
 0x545   : > { %v3822_v35 = vpop.f32.mrb[44].mxu1 }
 0x546   : > { %v3833_v1 = vmul.f32 %v7322_v56, %v3822_v35  ;;  %v3824_v41 = vpop.f32.mrb[45].mxu1 }
 0x547   : > { %v3834_v63 = vmul.f32 %v7324_v11, %v3824_v41 }
 0x54b   : > { %v6028_v34 = vpop.eup %6027 }
 0x54c   : > { %v4795_v24 = vrot.slane %v6028_v34, %v4794_v49  ;;  %v4799_v44 = vrot.slane %v6028_v34, %v4798_v33 }
 0x566   : > { %v4771_v15 = vpop.permute.xlu0 %4770 }
 0x567   : > { %v4785_v5 = vadd.f32 %v4771_v15, %v3829_v31  ;;  %v4786_v56 = vadd.f32 %v4771_v15, %v3830_v0  ;;  %v4766_v58 = vpop.permute.xlu1 %4765 }
 0x568   : > { %v4783_v47 = vadd.f32 %v4766_v58, %v3827_v12  ;;  %v4784_v11 = vadd.f32 %v4766_v58, %v3828_v21 }
 0x569   : > { %v4804_v53 = vadd.f32 %v4795_v24, %v4785_v5  ;;  %v4805_v55 = vadd.f32 %v4799_v44, %v4786_v56 }
 0x56a   : > { %v4802_v37 = vadd.f32 %v4795_v24, %v4783_v47  ;;  %v4803_v40 = vadd.f32 %v4799_v44, %v4784_v11  ;;  %v4781_v26 = vpop.permute.xlu0 %4780 }
 0x56b   : > { %v4812_v20 = vmul.f32 %v7154_v45, %v4804_v53  ;;  %v4813_v27 = vmul.f32 %v7146_v25, %v4805_v55  ;;  %v4789_v60 = vadd.f32 %v4781_v26, %v3833_v1  ;;  %v4790_v42 = vadd.f32 %v4781_v26, %v3834_v63  ;;  %v4776_v4 = vpop.permute.xlu1 %4775 }
 0x56c   : > { %v4810_v54 = vmul.f32 %v7151_v8, %v4802_v37  ;;  %v4811_v19 = vmul.f32 %v7143_v29, %v4803_v40  ;;  %v4787_v52 = vadd.f32 %v4776_v4, %v3831_v39  ;;  %v4788_v43 = vadd.f32 %v4776_v4, %v3832_v50 }
 0x56d   : > { %4820 = vst [vmem:[%s325_s14 + $0x10] sm:$0xff] %v4812_v20  ;;  %4821 = vst [vmem:[%s325_s14 + $0x18] sm:$0xff] %v4813_v27  ;;  %v4808_v46 = vadd.f32 %v4795_v24, %v4789_v60  ;;  %v4809_v2 = vadd.f32 %v4799_v44, %v4790_v42 }
 0x56e   : > { %4818 = vst [vmem:[%s325_s14] sm:$0xff] %v4810_v54  ;;  %4819 = vst [vmem:[%s325_s14 + $0x8] sm:$0xff] %v4811_v19  ;;  %v4806_v25 = vadd.f32 %v4795_v24, %v4787_v52  ;;  %v4807_v45 = vadd.f32 %v4799_v44, %v4788_v43 }
 0x56f   : > { %v4816_v7 = vmul.f32 %v7174_v13, %v4808_v46  ;;  %v4817_v8 = vmul.f32 %v7170_v18, %v4809_v2 }
 0x570   : > { %v4814_v29 = vmul.f32 %v7163_v14, %v4806_v25  ;;  %v4815_v59 = vmul.f32 %v7159_v23, %v4807_v45 }
 0x571   : > { %4824 = vst [vmem:[%s325_s14 + $0x30] sm:$0xff] %v4816_v7  ;;  %4825 = vst [vmem:[%s325_s14 + $0x38] sm:$0xff] %v4817_v8 }
 0x572   : > { %4822 = vst [vmem:[%s325_s14 + $0x20] sm:$0xff] %v4814_v29  ;;  %4823 = vst [vmem:[%s325_s14 + $0x28] sm:$0xff] %v4815_v59 }
 0x573   : > { %6050 = shalt.err (!%p6047_p3)
}
 0x574   : > { %s6051_s26 = scalar_lea.hbm %s7411_s13, 1024  ;;  %s6055_s16 = scalar_lea.hbm %s7470_s9, 2048 }
 0x575   : > { %p6052_p4 = scmp.ne.s32.totalorder %s7411_s13, %s6051_s26  ;;  %p6056_p9 = scmp.lt.u32.totalorder %s7411_s13, %s7470_s9 }
 0x576   : > { %p6057_p10 = scmp.lt.u32.totalorder %s6055_s16, %s6051_s26  ;;  %p6059_p12 = scmp.lt.u32.totalorder %s6051_s26, %s7411_s13 }
 0x577   : > { %p6053_p7 = pnand %p6052_p4, %p6205_p5 }
 0x578   : > { %p6058_p11 = por %p6057_p10, %p6056_p9 }
 0x579   : > { %p6054_p8 = pneg %p6053_p7 }
 0x57a   : > { %p6060_p13 = por %p6059_p12, %p6058_p11 }
 0x57c   : > { %p6061_p0 = pnand %p6060_p13, %p6054_p8 }
 0x57e   : > { %6064 = shalt.err (!%p6061_p0)
}
 0x57f   : > { %s6116_s22 = smov 256  }
 0x580   : > { %5953 = dma.vmem_to_hbm [thread:$0]  (%p6205_p5), %s7415_s25, 1024, %s7411_s13, %s7419_s21, %s6116_s22, %s6116_s22, %s6108_s23  }
 0x581 PF: > { %p5959_p1 = scmp.ge.s32.totalorder %s6099_s12, 2  ;;  %s4855_s24 = sand.u32 1, %s6087_s30  }
 0x582   : > { %s4856_s27 = scalar_lea.sflag [#allocation3], %s4855_s24 }
 0x583   : > { %p5956_p2 = pnand %p5959_p1, %p6209_p6 }
 0x585   : > { %6082 = dma.done.wait (!%p5956_p2), %s4856_s27, 1024  }
 0x586   : > { %6084 = vsyncadd (!%p5956_p2), %s4856_s27, 4294966272  ;;  %p19_p3 = scmp.ge.s32.totalorder %s6192_s15, 4   ;;  %s7615_s30 = smov %s6091_s10 }
 0x587   : > { %s7616_s10 = smov %s6095_s11  ;;  %s7617_s11 = smov %s6203_s18 }
 0x588   : > { %s7618_s12 = smov %s6192_s15  ;;  %21 = sbr.rel (!%p19_p3) target bundleno = 3 (0x3), region = 99 }
 0x58f   :  { %4861 = vsyncpa [#allocation3], 1 }
 0x590   :  { %4863 = vsyncpa [#allocation3 + $0x1], 1 }

</bundles_post_ra>
